<compile_context>
chip_gen: v5e
topology: v5e:2x2
jax: 0.10.0
libtpu: 0.0.40
codegen_flags: <defaults>
</compile_context>

<pallas_src>
import functools

import jax
import jax.numpy as jnp
from jax.experimental import pallas as pl
from jax.experimental.pallas import tpu as pltpu


# ----------------------------------------------------------------------------
# Fused Pallas kernel (all layers + head, single invocation)
# ----------------------------------------------------------------------------
def _make_fused_lstm_kernel(num_layers, T, Bp, H):
    """Build the fused kernel for a static (num_layers, T, Bp, H) configuration.

    Kernel ref layout (positional):
      x_ref                      : (T*Bp, D_in)   time-major, batch padded to Bp
      [w_ih_l, w_hh_l, b_l] * L  : (D_l, 4H), (H, 4H), (1, 4H)   per layer
      w_out, b_out               : (H, O), (1, O)
      out_ref                    : (T*Bp, O)
      act_a, act_b               : (T*Bp, H) f32 VMEM scratch (ping-pong activations)
    """

    def kernel(x_ref, *rest):
        n = 3 * num_layers
        layer_refs = rest[:n]
        w_out_ref = rest[n]
        b_out_ref = rest[n + 1]
        out_ref = rest[n + 2]
        act_scr = (rest[n + 3], rest[n + 4])  # ping-pong inter-layer activations

        cur = x_ref[...]  # (T*Bp, D_in) current layer input, time-major

        for l in range(num_layers):
            w_ih = layer_refs[3 * l][...]      # (D_in, 4H), gate order i,f,g,o
            w_hh = layer_refs[3 * l + 1][...]  # (H, 4H)
            b = layer_refs[3 * l + 2][...]     # (1, 4H) = b_ih + b_hh

            # Hoisted input projection for ALL timesteps: one MXU-friendly matmul,
            # off the sequential critical path.
            xg = jnp.dot(cur, w_ih, preferred_element_type=jnp.float32) + b  # (T*Bp, 4H)

            dst = act_scr[l % 2]
            h = jnp.zeros((Bp, H), jnp.float32)
            c = jnp.zeros((Bp, H), jnp.float32)

            # Statically unrolled recurrence: only h @ W_hh is serialized per step.
            for t in range(T):
                g = xg[t * Bp:(t + 1) * Bp, :] + jnp.dot(
                    h, w_hh, preferred_element_type=jnp.float32)        # (Bp, 4H)
                # Full-vreg EUP passes (4H = lane-dense), then static lane slices.
                sg = jax.nn.sigmoid(g)
                tg = jnp.tanh(g)
                i_g = sg[:, 0 * H:1 * H]
                f_g = sg[:, 1 * H:2 * H]
                g_g = tg[:, 2 * H:3 * H]
                o_g = sg[:, 3 * H:4 * H]
                c = f_g * c + i_g * g_g
                h = o_g * jnp.tanh(c)
                dst[t * Bp:(t + 1) * Bp, :] = h   # static, 8-aligned sublane slice

            cur = dst[...]  # (T*Bp, H) feeds the next layer / the head (stays in VMEM)

        # Fused Linear head: (T*Bp, H) @ (H, O) + (1, O).
        y = jnp.dot(cur, w_out_ref[...], preferred_element_type=jnp.float32) + b_out_ref[...]
        out_ref[...] = y.astype(out_ref.dtype)

    return kernel


# ----------------------------------------------------------------------------
# Wrapper
# ----------------------------------------------------------------------------
@functools.partial(jax.jit, static_argnums=(2, 3))
def lstm_network_forward(x, params, num_layers, hidden_size):
    """Forward pass of LSTMNetwork.  x: (B, T, input_size) -> (B, T, output_size)."""
    B, T, D = x.shape
    H = hidden_size
    O = params["head"]["w"].shape[0]
    Bp = max(8, ((B + 7) // 8) * 8)  # pad batch to a sublane multiple

    x = x.astype(jnp.float32)
    x_tm = jnp.transpose(x, (1, 0, 2))          # (T, B, D) time-major (tiny, one-off)
    if Bp != B:
        x_tm = jnp.pad(x_tm, ((0, 0), (0, Bp - B), (0, 0)))
    x2d = x_tm.reshape(T * Bp, D)

    flat = []
    for l in range(num_layers):
        p = params["lstm"][l]
        flat.append(p["w_ih"].T.astype(jnp.float32))                    # (D_in, 4H)
        flat.append(p["w_hh"].T.astype(jnp.float32))                    # (H, 4H)
        flat.append((p["b_ih"] + p["b_hh"])[None, :].astype(jnp.float32))  # (1, 4H)
    flat.append(params["head"]["w"].T.astype(jnp.float32))              # (H, O)
    flat.append(params["head"]["b"][None, :].astype(jnp.float32))       # (1, O)

    kernel = _make_fused_lstm_kernel(num_layers, T, Bp, H)
    # Everything (activations + weights at these sizes) fits in VMEM on v5e/v6e/v7x;
    # no grid -> single invocation, whole arrays resident in VMEM.
    # For large H / large B*T one would add an M-tiled grid and bf16 weights
    # (v7x: 64 MiB VMEM budget), but it is unnecessary at these shapes.
    y2d = pl.pallas_call(
        kernel,
        out_shape=jax.ShapeDtypeStruct((T * Bp, O), jnp.float32),
        scratch_shapes=[
            pltpu.VMEM((T * Bp, H), jnp.float32),  # activations (ping)
            pltpu.VMEM((T * Bp, H), jnp.float32),  # activations (pong)
        ],
    )(x2d, *flat)

    y = y2d.reshape(T, Bp, O)[:, :B, :]          # drop batch padding
    return jnp.transpose(y, (1, 0, 2))           # (B, T, O) batch-first


# ----------------------------------------------------------------------------
# Pure-JAX reference (mirrors torch.nn.LSTM + nn.Linear semantics)
# ----------------------------------------------------------------------------
def lstm_network_ref(x, params, num_layers, hidden_size):
    H = hidden_size
    out = x.astype(jnp.float32)
    B = out.shape[0]
    for l in range(num_layers):
        p = params["lstm"][l]
        w_ih, w_hh = p["w_ih"], p["w_hh"]
        b = p["b_ih"] + p["b_hh"]

        def step(carry, x_t):
            h, c = carry
            gates = x_t @ w_ih.T + h @ w_hh.T + b
            i = jax.nn.sigmoid(gates[:, 0 * H:1 * H])
            f = jax.nn.sigmoid(gates[:, 1 * H:2 * H])
            g = jnp.tanh(gates[:, 2 * H:3 * H])
            o = jax.nn.sigmoid(gates[:, 3 * H:4 * H])
            c = f * c + i * g
            h = o * jnp.tanh(c)
            return (h, c), h

        h0 = jnp.zeros((B, H), jnp.float32)
        c0 = jnp.zeros((B, H), jnp.float32)
        _, hs = jax.lax.scan(step, (h0, c0), jnp.transpose(out, (1, 0, 2)))
        out = jnp.transpose(hs, (1, 0, 2))
    return out @ params["head"]["w"].T + params["head"]["b"]


# ----------------------------------------------------------------------------
# Deterministic parameter init (PyTorch default: U(-1/sqrt(H), 1/sqrt(H)))
# ----------------------------------------------------------------------------
def init_params(key, input_size, hidden_size, num_layers, output_size):
    H = hidden_size
    k = 1.0 / jnp.sqrt(H)
    params = {"lstm": [], "head": {}}
    for l in range(num_layers):
        d_in = input_size if l == 0 else hidden_size
        key, k1, k2, k3, k4 = jax.random.split(key, 5)
        params["lstm"].append({
            "w_ih": jax.random.uniform(k1, (4 * H, d_in), jnp.float32, -k, k),
            "w_hh": jax.random.uniform(k2, (4 * H, H), jnp.float32, -k, k),
            "b_ih": jax.random.uniform(k3, (4 * H,), jnp.float32, -k, k),
            "b_hh": jax.random.uniform(k4, (4 * H,), jnp.float32, -k, k),
        })
    key, k5, k6 = jax.random.split(key, 3)
    params["head"]["w"] = jax.random.uniform(k5, (output_size, H), jnp.float32, -k, k)
    params["head"]["b"] = jax.random.uniform(k6, (output_size,), jnp.float32, -k, k)
    return params


# ----------------------------------------------------------------------------
if __name__ == "__main__":
    # LSTMNetwork(input_size=16, hidden_size=32, hidden_layers=2, output_size=8,
    #             drop_rate=0.0, batch_first=True)
    INPUT_SIZE, HIDDEN_SIZE, NUM_LAYERS, OUTPUT_SIZE = 16, 32, 2, 8
    B, T = 4, 8

    key = jax.random.PRNGKey(0)
    key, kx = jax.random.split(key)
    x = jax.random.normal(kx, (B, T, INPUT_SIZE), jnp.float32)
    params = init_params(key, INPUT_SIZE, HIDDEN_SIZE, NUM_LAYERS, OUTPUT_SIZE)

    out = lstm_network_forward(x, params, NUM_LAYERS, HIDDEN_SIZE)
    out = jax.block_until_ready(out)

    ref = lstm_network_ref(x, params, NUM_LAYERS, HIDDEN_SIZE)
    assert out.shape == (B, T, OUTPUT_SIZE), out.shape
    err = float(jnp.max(jnp.abs(out - ref)))
    assert jnp.allclose(out, ref, atol=2e-5, rtol=2e-5), err

    print("KERNEL_OK")
</pallas_src>

<mosaic_0001>
module attributes {stable_mosaic.version = 11 : i64} {
  func.func @kernel(%arg0: memref<64x16xf32, #tpu.memory_space<vmem>>, %arg1: memref<16x128xf32, #tpu.memory_space<vmem>>, %arg2: memref<32x128xf32, #tpu.memory_space<vmem>>, %arg3: memref<1x128xf32, #tpu.memory_space<vmem>>, %arg4: memref<32x128xf32, #tpu.memory_space<vmem>>, %arg5: memref<32x128xf32, #tpu.memory_space<vmem>>, %arg6: memref<1x128xf32, #tpu.memory_space<vmem>>, %arg7: memref<32x8xf32, #tpu.memory_space<vmem>>, %arg8: memref<1x8xf32, #tpu.memory_space<vmem>>, %arg9: memref<64x8xf32, #tpu.memory_space<vmem>>, %arg10: memref<64x32xf32, #tpu.memory_space<vmem>>, %arg11: memref<64x32xf32, #tpu.memory_space<vmem>>) attributes {dimension_semantics = [], scalar_prefetch = 0 : i64, scratch_operands = 2 : i64, tpu.core_type = #tpu.core_type<tc>} {
    %c0 = arith.constant 0 : index
    %c0_0 = arith.constant 0 : index
    %0 = vector.load %arg0[%c0, %c0_0] : memref<64x16xf32, #tpu.memory_space<vmem>>, vector<64x16xf32>
    %c0_1 = arith.constant 0 : index
    %c0_2 = arith.constant 0 : index
    %1 = vector.load %arg1[%c0_1, %c0_2] : memref<16x128xf32, #tpu.memory_space<vmem>>, vector<16x128xf32>
    %c0_3 = arith.constant 0 : index
    %c0_4 = arith.constant 0 : index
    %2 = vector.load %arg2[%c0_3, %c0_4] : memref<32x128xf32, #tpu.memory_space<vmem>>, vector<32x128xf32>
    %c0_5 = arith.constant 0 : index
    %c0_6 = arith.constant 0 : index
    %3 = vector.load %arg3[%c0_5, %c0_6] : memref<1x128xf32, #tpu.memory_space<vmem>>, vector<1x128xf32>
    %cst = arith.constant dense<0.000000e+00> : vector<64x128xf32>
    %4 = tpu.matmul %0, %1, %cst {dimension_numbers = #tpu.dot_dimension_numbers<[1], [0], [0], [1], [0, 0, 1, 1], [], []>} : vector<64x16xf32>, vector<16x128xf32>, vector<64x128xf32> -> vector<64x128xf32>
    %5 = vector.broadcast %3 : vector<1x128xf32> to vector<64x128xf32>
    %6 = arith.addf %4, %5 : vector<64x128xf32>
    %cst_7 = arith.constant 0.000000e+00 : f32
    %7 = vector.broadcast %cst_7 : f32 to vector<8x32xf32>
    %cst_8 = arith.constant 0.000000e+00 : f32
    %8 = vector.broadcast %cst_8 : f32 to vector<8x32xf32>
    %9 = vector.extract_strided_slice %6 {offsets = [0, 0], sizes = [8, 128], strides = [1, 1]} : vector<64x128xf32> to vector<8x128xf32>
    %cst_9 = arith.constant dense<0.000000e+00> : vector<8x128xf32>
    %10 = tpu.matmul %7, %2, %cst_9 {dimension_numbers = #tpu.dot_dimension_numbers<[1], [0], [0], [1], [0, 0, 1, 1], [], []>} : vector<8x32xf32>, vector<32x128xf32>, vector<8x128xf32> -> vector<8x128xf32>
    %11 = arith.addf %9, %10 : vector<8x128xf32>
    %12 = arith.negf %11 : vector<8x128xf32>
    %13 = math.exp %12 : vector<8x128xf32>
    %cst_10 = arith.constant 1.000000e+00 : f32
    %14 = vector.broadcast %cst_10 : f32 to vector<8x128xf32>
    %15 = arith.addf %14, %13 : vector<8x128xf32>
    %16 = arith.divf %14, %15 : vector<8x128xf32>
    %17 = math.tanh %11 : vector<8x128xf32>
    %18 = vector.extract_strided_slice %16 {offsets = [0, 0], sizes = [8, 32], strides = [1, 1]} : vector<8x128xf32> to vector<8x32xf32>
    %19 = vector.extract_strided_slice %16 {offsets = [0, 32], sizes = [8, 32], strides = [1, 1]} : vector<8x128xf32> to vector<8x32xf32>
    %20 = vector.extract_strided_slice %17 {offsets = [0, 64], sizes = [8, 32], strides = [1, 1]} : vector<8x128xf32> to vector<8x32xf32>
    %21 = vector.extract_strided_slice %16 {offsets = [0, 96], sizes = [8, 32], strides = [1, 1]} : vector<8x128xf32> to vector<8x32xf32>
    %22 = arith.mulf %19, %8 : vector<8x32xf32>
    %23 = arith.mulf %18, %20 : vector<8x32xf32>
    %24 = arith.addf %22, %23 : vector<8x32xf32>
    %25 = math.tanh %24 : vector<8x32xf32>
    %26 = arith.mulf %21, %25 : vector<8x32xf32>
    %c0_11 = arith.constant 0 : index
    %c0_12 = arith.constant 0 : index
    %27 = vector.load %arg10[%c0_11, %c0_12] : memref<64x32xf32, #tpu.memory_space<vmem>>, vector<8x32xf32>
    tpu.vector_store %arg10[%c0_11, %c0_12], %26 {strides = array<i32>} : memref<64x32xf32, #tpu.memory_space<vmem>>, vector<8x32xf32>,
    %28 = vector.extract_strided_slice %6 {offsets = [8, 0], sizes = [8, 128], strides = [1, 1]} : vector<64x128xf32> to vector<8x128xf32>
    %cst_13 = arith.constant dense<0.000000e+00> : vector<8x128xf32>
    %29 = tpu.matmul %26, %2, %cst_13 {dimension_numbers = #tpu.dot_dimension_numbers<[1], [0], [0], [1], [0, 0, 1, 1], [], []>} : vector<8x32xf32>, vector<32x128xf32>, vector<8x128xf32> -> vector<8x128xf32>
    %30 = arith.addf %28, %29 : vector<8x128xf32>
    %31 = arith.negf %30 : vector<8x128xf32>
    %32 = math.exp %31 : vector<8x128xf32>
    %cst_14 = arith.constant 1.000000e+00 : f32
    %33 = vector.broadcast %cst_14 : f32 to vector<8x128xf32>
    %34 = arith.addf %33, %32 : vector<8x128xf32>
    %35 = arith.divf %33, %34 : vector<8x128xf32>
    %36 = math.tanh %30 : vector<8x128xf32>
    %37 = vector.extract_strided_slice %35 {offsets = [0, 0], sizes = [8, 32], strides = [1, 1]} : vector<8x128xf32> to vector<8x32xf32>
    %38 = vector.extract_strided_slice %35 {offsets = [0, 32], sizes = [8, 32], strides = [1, 1]} : vector<8x128xf32> to vector<8x32xf32>
    %39 = vector.extract_strided_slice %36 {offsets = [0, 64], sizes = [8, 32], strides = [1, 1]} : vector<8x128xf32> to vector<8x32xf32>
    %40 = vector.extract_strided_slice %35 {offsets = [0, 96], sizes = [8, 32], strides = [1, 1]} : vector<8x128xf32> to vector<8x32xf32>
    %41 = arith.mulf %38, %24 : vector<8x32xf32>
    %42 = arith.mulf %37, %39 : vector<8x32xf32>
    %43 = arith.addf %41, %42 : vector<8x32xf32>
    %44 = math.tanh %43 : vector<8x32xf32>
    %45 = arith.mulf %40, %44 : vector<8x32xf32>
    %c8 = arith.constant 8 : index
    %c0_15 = arith.constant 0 : index
    %46 = vector.load %arg10[%c8, %c0_15] : memref<64x32xf32, #tpu.memory_space<vmem>>, vector<8x32xf32>
    tpu.vector_store %arg10[%c8, %c0_15], %45 {strides = array<i32>} : memref<64x32xf32, #tpu.memory_space<vmem>>, vector<8x32xf32>,
    %47 = vector.extract_strided_slice %6 {offsets = [16, 0], sizes = [8, 128], strides = [1, 1]} : vector<64x128xf32> to vector<8x128xf32>
    %cst_16 = arith.constant dense<0.000000e+00> : vector<8x128xf32>
    %48 = tpu.matmul %45, %2, %cst_16 {dimension_numbers = #tpu.dot_dimension_numbers<[1], [0], [0], [1], [0, 0, 1, 1], [], []>} : vector<8x32xf32>, vector<32x128xf32>, vector<8x128xf32> -> vector<8x128xf32>
    %49 = arith.addf %47, %48 : vector<8x128xf32>
    %50 = arith.negf %49 : vector<8x128xf32>
    %51 = math.exp %50 : vector<8x128xf32>
    %cst_17 = arith.constant 1.000000e+00 : f32
    %52 = vector.broadcast %cst_17 : f32 to vector<8x128xf32>
    %53 = arith.addf %52, %51 : vector<8x128xf32>
    %54 = arith.divf %52, %53 : vector<8x128xf32>
    %55 = math.tanh %49 : vector<8x128xf32>
    %56 = vector.extract_strided_slice %54 {offsets = [0, 0], sizes = [8, 32], strides = [1, 1]} : vector<8x128xf32> to vector<8x32xf32>
    %57 = vector.extract_strided_slice %54 {offsets = [0, 32], sizes = [8, 32], strides = [1, 1]} : vector<8x128xf32> to vector<8x32xf32>
    %58 = vector.extract_strided_slice %55 {offsets = [0, 64], sizes = [8, 32], strides = [1, 1]} : vector<8x128xf32> to vector<8x32xf32>
    %59 = vector.extract_strided_slice %54 {offsets = [0, 96], sizes = [8, 32], strides = [1, 1]} : vector<8x128xf32> to vector<8x32xf32>
    %60 = arith.mulf %57, %43 : vector<8x32xf32>
    %61 = arith.mulf %56, %58 : vector<8x32xf32>
    %62 = arith.addf %60, %61 : vector<8x32xf32>
    %63 = math.tanh %62 : vector<8x32xf32>
    %64 = arith.mulf %59, %63 : vector<8x32xf32>
    %c16 = arith.constant 16 : index
    %c0_18 = arith.constant 0 : index
    %65 = vector.load %arg10[%c16, %c0_18] : memref<64x32xf32, #tpu.memory_space<vmem>>, vector<8x32xf32>
    tpu.vector_store %arg10[%c16, %c0_18], %64 {strides = array<i32>} : memref<64x32xf32, #tpu.memory_space<vmem>>, vector<8x32xf32>,
    %66 = vector.extract_strided_slice %6 {offsets = [24, 0], sizes = [8, 128], strides = [1, 1]} : vector<64x128xf32> to vector<8x128xf32>
    %cst_19 = arith.constant dense<0.000000e+00> : vector<8x128xf32>
    %67 = tpu.matmul %64, %2, %cst_19 {dimension_numbers = #tpu.dot_dimension_numbers<[1], [0], [0], [1], [0, 0, 1, 1], [], []>} : vector<8x32xf32>, vector<32x128xf32>, vector<8x128xf32> -> vector<8x128xf32>
    %68 = arith.addf %66, %67 : vector<8x128xf32>
    %69 = arith.negf %68 : vector<8x128xf32>
    %70 = math.exp %69 : vector<8x128xf32>
    %cst_20 = arith.constant 1.000000e+00 : f32
    %71 = vector.broadcast %cst_20 : f32 to vector<8x128xf32>
    %72 = arith.addf %71, %70 : vector<8x128xf32>
    %73 = arith.divf %71, %72 : vector<8x128xf32>
    %74 = math.tanh %68 : vector<8x128xf32>
    %75 = vector.extract_strided_slice %73 {offsets = [0, 0], sizes = [8, 32], strides = [1, 1]} : vector<8x128xf32> to vector<8x32xf32>
    %76 = vector.extract_strided_slice %73 {offsets = [0, 32], sizes = [8, 32], strides = [1, 1]} : vector<8x128xf32> to vector<8x32xf32>
    %77 = vector.extract_strided_slice %74 {offsets = [0, 64], sizes = [8, 32], strides = [1, 1]} : vector<8x128xf32> to vector<8x32xf32>
    %78 = vector.extract_strided_slice %73 {offsets = [0, 96], sizes = [8, 32], strides = [1, 1]} : vector<8x128xf32> to vector<8x32xf32>
    %79 = arith.mulf %76, %62 : vector<8x32xf32>
    %80 = arith.mulf %75, %77 : vector<8x32xf32>
    %81 = arith.addf %79, %80 : vector<8x32xf32>
    %82 = math.tanh %81 : vector<8x32xf32>
    %83 = arith.mulf %78, %82 : vector<8x32xf32>
    %c24 = arith.constant 24 : index
    %c0_21 = arith.constant 0 : index
    %84 = vector.load %arg10[%c24, %c0_21] : memref<64x32xf32, #tpu.memory_space<vmem>>, vector<8x32xf32>
    tpu.vector_store %arg10[%c24, %c0_21], %83 {strides = array<i32>} : memref<64x32xf32, #tpu.memory_space<vmem>>, vector<8x32xf32>,
    %85 = vector.extract_strided_slice %6 {offsets = [32, 0], sizes = [8, 128], strides = [1, 1]} : vector<64x128xf32> to vector<8x128xf32>
    %cst_22 = arith.constant dense<0.000000e+00> : vector<8x128xf32>
    %86 = tpu.matmul %83, %2, %cst_22 {dimension_numbers = #tpu.dot_dimension_numbers<[1], [0], [0], [1], [0, 0, 1, 1], [], []>} : vector<8x32xf32>, vector<32x128xf32>, vector<8x128xf32> -> vector<8x128xf32>
    %87 = arith.addf %85, %86 : vector<8x128xf32>
    %88 = arith.negf %87 : vector<8x128xf32>
    %89 = math.exp %88 : vector<8x128xf32>
    %cst_23 = arith.constant 1.000000e+00 : f32
    %90 = vector.broadcast %cst_23 : f32 to vector<8x128xf32>
    %91 = arith.addf %90, %89 : vector<8x128xf32>
    %92 = arith.divf %90, %91 : vector<8x128xf32>
    %93 = math.tanh %87 : vector<8x128xf32>
    %94 = vector.extract_strided_slice %92 {offsets = [0, 0], sizes = [8, 32], strides = [1, 1]} : vector<8x128xf32> to vector<8x32xf32>
    %95 = vector.extract_strided_slice %92 {offsets = [0, 32], sizes = [8, 32], strides = [1, 1]} : vector<8x128xf32> to vector<8x32xf32>
    %96 = vector.extract_strided_slice %93 {offsets = [0, 64], sizes = [8, 32], strides = [1, 1]} : vector<8x128xf32> to vector<8x32xf32>
    %97 = vector.extract_strided_slice %92 {offsets = [0, 96], sizes = [8, 32], strides = [1, 1]} : vector<8x128xf32> to vector<8x32xf32>
    %98 = arith.mulf %95, %81 : vector<8x32xf32>
    %99 = arith.mulf %94, %96 : vector<8x32xf32>
    %100 = arith.addf %98, %99 : vector<8x32xf32>
    %101 = math.tanh %100 : vector<8x32xf32>
    %102 = arith.mulf %97, %101 : vector<8x32xf32>
    %c32 = arith.constant 32 : index
    %c0_24 = arith.constant 0 : index
    %103 = vector.load %arg10[%c32, %c0_24] : memref<64x32xf32, #tpu.memory_space<vmem>>, vector<8x32xf32>
    tpu.vector_store %arg10[%c32, %c0_24], %102 {strides = array<i32>} : memref<64x32xf32, #tpu.memory_space<vmem>>, vector<8x32xf32>,
    %104 = vector.extract_strided_slice %6 {offsets = [40, 0], sizes = [8, 128], strides = [1, 1]} : vector<64x128xf32> to vector<8x128xf32>
    %cst_25 = arith.constant dense<0.000000e+00> : vector<8x128xf32>
    %105 = tpu.matmul %102, %2, %cst_25 {dimension_numbers = #tpu.dot_dimension_numbers<[1], [0], [0], [1], [0, 0, 1, 1], [], []>} : vector<8x32xf32>, vector<32x128xf32>, vector<8x128xf32> -> vector<8x128xf32>
    %106 = arith.addf %104, %105 : vector<8x128xf32>
    %107 = arith.negf %106 : vector<8x128xf32>
    %108 = math.exp %107 : vector<8x128xf32>
    %cst_26 = arith.constant 1.000000e+00 : f32
    %109 = vector.broadcast %cst_26 : f32 to vector<8x128xf32>
    %110 = arith.addf %109, %108 : vector<8x128xf32>
    %111 = arith.divf %109, %110 : vector<8x128xf32>
    %112 = math.tanh %106 : vector<8x128xf32>
    %113 = vector.extract_strided_slice %111 {offsets = [0, 0], sizes = [8, 32], strides = [1, 1]} : vector<8x128xf32> to vector<8x32xf32>
    %114 = vector.extract_strided_slice %111 {offsets = [0, 32], sizes = [8, 32], strides = [1, 1]} : vector<8x128xf32> to vector<8x32xf32>
    %115 = vector.extract_strided_slice %112 {offsets = [0, 64], sizes = [8, 32], strides = [1, 1]} : vector<8x128xf32> to vector<8x32xf32>
    %116 = vector.extract_strided_slice %111 {offsets = [0, 96], sizes = [8, 32], strides = [1, 1]} : vector<8x128xf32> to vector<8x32xf32>
    %117 = arith.mulf %114, %100 : vector<8x32xf32>
    %118 = arith.mulf %113, %115 : vector<8x32xf32>
    %119 = arith.addf %117, %118 : vector<8x32xf32>
    %120 = math.tanh %119 : vector<8x32xf32>
    %121 = arith.mulf %116, %120 : vector<8x32xf32>
    %c40 = arith.constant 40 : index
    %c0_27 = arith.constant 0 : index
    %122 = vector.load %arg10[%c40, %c0_27] : memref<64x32xf32, #tpu.memory_space<vmem>>, vector<8x32xf32>
    tpu.vector_store %arg10[%c40, %c0_27], %121 {strides = array<i32>} : memref<64x32xf32, #tpu.memory_space<vmem>>, vector<8x32xf32>,
    %123 = vector.extract_strided_slice %6 {offsets = [48, 0], sizes = [8, 128], strides = [1, 1]} : vector<64x128xf32> to vector<8x128xf32>
    %cst_28 = arith.constant dense<0.000000e+00> : vector<8x128xf32>
    %124 = tpu.matmul %121, %2, %cst_28 {dimension_numbers = #tpu.dot_dimension_numbers<[1], [0], [0], [1], [0, 0, 1, 1], [], []>} : vector<8x32xf32>, vector<32x128xf32>, vector<8x128xf32> -> vector<8x128xf32>
    %125 = arith.addf %123, %124 : vector<8x128xf32>
    %126 = arith.negf %125 : vector<8x128xf32>
    %127 = math.exp %126 : vector<8x128xf32>
    %cst_29 = arith.constant 1.000000e+00 : f32
    %128 = vector.broadcast %cst_29 : f32 to vector<8x128xf32>
    %129 = arith.addf %128, %127 : vector<8x128xf32>
    %130 = arith.divf %128, %129 : vector<8x128xf32>
    %131 = math.tanh %125 : vector<8x128xf32>
    %132 = vector.extract_strided_slice %130 {offsets = [0, 0], sizes = [8, 32], strides = [1, 1]} : vector<8x128xf32> to vector<8x32xf32>
    %133 = vector.extract_strided_slice %130 {offsets = [0, 32], sizes = [8, 32], strides = [1, 1]} : vector<8x128xf32> to vector<8x32xf32>
    %134 = vector.extract_strided_slice %131 {offsets = [0, 64], sizes = [8, 32], strides = [1, 1]} : vector<8x128xf32> to vector<8x32xf32>
    %135 = vector.extract_strided_slice %130 {offsets = [0, 96], sizes = [8, 32], strides = [1, 1]} : vector<8x128xf32> to vector<8x32xf32>
    %136 = arith.mulf %133, %119 : vector<8x32xf32>
    %137 = arith.mulf %132, %134 : vector<8x32xf32>
    %138 = arith.addf %136, %137 : vector<8x32xf32>
    %139 = math.tanh %138 : vector<8x32xf32>
    %140 = arith.mulf %135, %139 : vector<8x32xf32>
    %c48 = arith.constant 48 : index
    %c0_30 = arith.constant 0 : index
    %141 = vector.load %arg10[%c48, %c0_30] : memref<64x32xf32, #tpu.memory_space<vmem>>, vector<8x32xf32>
    tpu.vector_store %arg10[%c48, %c0_30], %140 {strides = array<i32>} : memref<64x32xf32, #tpu.memory_space<vmem>>, vector<8x32xf32>,
    %142 = vector.extract_strided_slice %6 {offsets = [56, 0], sizes = [8, 128], strides = [1, 1]} : vector<64x128xf32> to vector<8x128xf32>
    %cst_31 = arith.constant dense<0.000000e+00> : vector<8x128xf32>
    %143 = tpu.matmul %140, %2, %cst_31 {dimension_numbers = #tpu.dot_dimension_numbers<[1], [0], [0], [1], [0, 0, 1, 1], [], []>} : vector<8x32xf32>, vector<32x128xf32>, vector<8x128xf32> -> vector<8x128xf32>
    %144 = arith.addf %142, %143 : vector<8x128xf32>
    %145 = arith.negf %144 : vector<8x128xf32>
    %146 = math.exp %145 : vector<8x128xf32>
    %cst_32 = arith.constant 1.000000e+00 : f32
    %147 = vector.broadcast %cst_32 : f32 to vector<8x128xf32>
    %148 = arith.addf %147, %146 : vector<8x128xf32>
    %149 = arith.divf %147, %148 : vector<8x128xf32>
    %150 = math.tanh %144 : vector<8x128xf32>
    %151 = vector.extract_strided_slice %149 {offsets = [0, 0], sizes = [8, 32], strides = [1, 1]} : vector<8x128xf32> to vector<8x32xf32>
    %152 = vector.extract_strided_slice %149 {offsets = [0, 32], sizes = [8, 32], strides = [1, 1]} : vector<8x128xf32> to vector<8x32xf32>
    %153 = vector.extract_strided_slice %150 {offsets = [0, 64], sizes = [8, 32], strides = [1, 1]} : vector<8x128xf32> to vector<8x32xf32>
    %154 = vector.extract_strided_slice %149 {offsets = [0, 96], sizes = [8, 32], strides = [1, 1]} : vector<8x128xf32> to vector<8x32xf32>
    %155 = arith.mulf %152, %138 : vector<8x32xf32>
    %156 = arith.mulf %151, %153 : vector<8x32xf32>
    %157 = arith.addf %155, %156 : vector<8x32xf32>
    %158 = math.tanh %157 : vector<8x32xf32>
    %159 = arith.mulf %154, %158 : vector<8x32xf32>
    %c56 = arith.constant 56 : index
    %c0_33 = arith.constant 0 : index
    %160 = vector.load %arg10[%c56, %c0_33] : memref<64x32xf32, #tpu.memory_space<vmem>>, vector<8x32xf32>
    tpu.vector_store %arg10[%c56, %c0_33], %159 {strides = array<i32>} : memref<64x32xf32, #tpu.memory_space<vmem>>, vector<8x32xf32>,
    %c0_34 = arith.constant 0 : index
    %c0_35 = arith.constant 0 : index
    %161 = vector.load %arg10[%c0_34, %c0_35] : memref<64x32xf32, #tpu.memory_space<vmem>>, vector<64x32xf32>
    %c0_36 = arith.constant 0 : index
    %c0_37 = arith.constant 0 : index
    %162 = vector.load %arg4[%c0_36, %c0_37] : memref<32x128xf32, #tpu.memory_space<vmem>>, vector<32x128xf32>
    %c0_38 = arith.constant 0 : index
    %c0_39 = arith.constant 0 : index
    %163 = vector.load %arg5[%c0_38, %c0_39] : memref<32x128xf32, #tpu.memory_space<vmem>>, vector<32x128xf32>
    %c0_40 = arith.constant 0 : index
    %c0_41 = arith.constant 0 : index
    %164 = vector.load %arg6[%c0_40, %c0_41] : memref<1x128xf32, #tpu.memory_space<vmem>>, vector<1x128xf32>
    %cst_42 = arith.constant dense<0.000000e+00> : vector<64x128xf32>
    %165 = tpu.matmul %161, %162, %cst_42 {dimension_numbers = #tpu.dot_dimension_numbers<[1], [0], [0], [1], [0, 0, 1, 1], [], []>} : vector<64x32xf32>, vector<32x128xf32>, vector<64x128xf32> -> vector<64x128xf32>
    %166 = vector.broadcast %164 : vector<1x128xf32> to vector<64x128xf32>
    %167 = arith.addf %165, %166 : vector<64x128xf32>
    %cst_43 = arith.constant 0.000000e+00 : f32
    %168 = vector.broadcast %cst_43 : f32 to vector<8x32xf32>
    %cst_44 = arith.constant 0.000000e+00 : f32
    %169 = vector.broadcast %cst_44 : f32 to vector<8x32xf32>
    %170 = vector.extract_strided_slice %167 {offsets = [0, 0], sizes = [8, 128], strides = [1, 1]} : vector<64x128xf32> to vector<8x128xf32>
    %cst_45 = arith.constant dense<0.000000e+00> : vector<8x128xf32>
    %171 = tpu.matmul %168, %163, %cst_45 {dimension_numbers = #tpu.dot_dimension_numbers<[1], [0], [0], [1], [0, 0, 1, 1], [], []>} : vector<8x32xf32>, vector<32x128xf32>, vector<8x128xf32> -> vector<8x128xf32>
    %172 = arith.addf %170, %171 : vector<8x128xf32>
    %173 = arith.negf %172 : vector<8x128xf32>
    %174 = math.exp %173 : vector<8x128xf32>
    %cst_46 = arith.constant 1.000000e+00 : f32
    %175 = vector.broadcast %cst_46 : f32 to vector<8x128xf32>
    %176 = arith.addf %175, %174 : vector<8x128xf32>
    %177 = arith.divf %175, %176 : vector<8x128xf32>
    %178 = math.tanh %172 : vector<8x128xf32>
    %179 = vector.extract_strided_slice %177 {offsets = [0, 0], sizes = [8, 32], strides = [1, 1]} : vector<8x128xf32> to vector<8x32xf32>
    %180 = vector.extract_strided_slice %177 {offsets = [0, 32], sizes = [8, 32], strides = [1, 1]} : vector<8x128xf32> to vector<8x32xf32>
    %181 = vector.extract_strided_slice %178 {offsets = [0, 64], sizes = [8, 32], strides = [1, 1]} : vector<8x128xf32> to vector<8x32xf32>
    %182 = vector.extract_strided_slice %177 {offsets = [0, 96], sizes = [8, 32], strides = [1, 1]} : vector<8x128xf32> to vector<8x32xf32>
    %183 = arith.mulf %180, %169 : vector<8x32xf32>
    %184 = arith.mulf %179, %181 : vector<8x32xf32>
    %185 = arith.addf %183, %184 : vector<8x32xf32>
    %186 = math.tanh %185 : vector<8x32xf32>
    %187 = arith.mulf %182, %186 : vector<8x32xf32>
    %c0_47 = arith.constant 0 : index
    %c0_48 = arith.constant 0 : index
    %188 = vector.load %arg11[%c0_47, %c0_48] : memref<64x32xf32, #tpu.memory_space<vmem>>, vector<8x32xf32>
    tpu.vector_store %arg11[%c0_47, %c0_48], %187 {strides = array<i32>} : memref<64x32xf32, #tpu.memory_space<vmem>>, vector<8x32xf32>,
    %189 = vector.extract_strided_slice %167 {offsets = [8, 0], sizes = [8, 128], strides = [1, 1]} : vector<64x128xf32> to vector<8x128xf32>
    %cst_49 = arith.constant dense<0.000000e+00> : vector<8x128xf32>
    %190 = tpu.matmul %187, %163, %cst_49 {dimension_numbers = #tpu.dot_dimension_numbers<[1], [0], [0], [1], [0, 0, 1, 1], [], []>} : vector<8x32xf32>, vector<32x128xf32>, vector<8x128xf32> -> vector<8x128xf32>
    %191 = arith.addf %189, %190 : vector<8x128xf32>
    %192 = arith.negf %191 : vector<8x128xf32>
    %193 = math.exp %192 : vector<8x128xf32>
    %cst_50 = arith.constant 1.000000e+00 : f32
    %194 = vector.broadcast %cst_50 : f32 to vector<8x128xf32>
    %195 = arith.addf %194, %193 : vector<8x128xf32>
    %196 = arith.divf %194, %195 : vector<8x128xf32>
    %197 = math.tanh %191 : vector<8x128xf32>
    %198 = vector.extract_strided_slice %196 {offsets = [0, 0], sizes = [8, 32], strides = [1, 1]} : vector<8x128xf32> to vector<8x32xf32>
    %199 = vector.extract_strided_slice %196 {offsets = [0, 32], sizes = [8, 32], strides = [1, 1]} : vector<8x128xf32> to vector<8x32xf32>
    %200 = vector.extract_strided_slice %197 {offsets = [0, 64], sizes = [8, 32], strides = [1, 1]} : vector<8x128xf32> to vector<8x32xf32>
    %201 = vector.extract_strided_slice %196 {offsets = [0, 96], sizes = [8, 32], strides = [1, 1]} : vector<8x128xf32> to vector<8x32xf32>
    %202 = arith.mulf %199, %185 : vector<8x32xf32>
    %203 = arith.mulf %198, %200 : vector<8x32xf32>
    %204 = arith.addf %202, %203 : vector<8x32xf32>
    %205 = math.tanh %204 : vector<8x32xf32>
    %206 = arith.mulf %201, %205 : vector<8x32xf32>
    %c8_51 = arith.constant 8 : index
    %c0_52 = arith.constant 0 : index
    %207 = vector.load %arg11[%c8_51, %c0_52] : memref<64x32xf32, #tpu.memory_space<vmem>>, vector<8x32xf32>
    tpu.vector_store %arg11[%c8_51, %c0_52], %206 {strides = array<i32>} : memref<64x32xf32, #tpu.memory_space<vmem>>, vector<8x32xf32>,
    %208 = vector.extract_strided_slice %167 {offsets = [16, 0], sizes = [8, 128], strides = [1, 1]} : vector<64x128xf32> to vector<8x128xf32>
    %cst_53 = arith.constant dense<0.000000e+00> : vector<8x128xf32>
    %209 = tpu.matmul %206, %163, %cst_53 {dimension_numbers = #tpu.dot_dimension_numbers<[1], [0], [0], [1], [0, 0, 1, 1], [], []>} : vector<8x32xf32>, vector<32x128xf32>, vector<8x128xf32> -> vector<8x128xf32>
    %210 = arith.addf %208, %209 : vector<8x128xf32>
    %211 = arith.negf %210 : vector<8x128xf32>
    %212 = math.exp %211 : vector<8x128xf32>
    %cst_54 = arith.constant 1.000000e+00 : f32
    %213 = vector.broadcast %cst_54 : f32 to vector<8x128xf32>
    %214 = arith.addf %213, %212 : vector<8x128xf32>
    %215 = arith.divf %213, %214 : vector<8x128xf32>
    %216 = math.tanh %210 : vector<8x128xf32>
    %217 = vector.extract_strided_slice %215 {offsets = [0, 0], sizes = [8, 32], strides = [1, 1]} : vector<8x128xf32> to vector<8x32xf32>
    %218 = vector.extract_strided_slice %215 {offsets = [0, 32], sizes = [8, 32], strides = [1, 1]} : vector<8x128xf32> to vector<8x32xf32>
    %219 = vector.extract_strided_slice %216 {offsets = [0, 64], sizes = [8, 32], strides = [1, 1]} : vector<8x128xf32> to vector<8x32xf32>
    %220 = vector.extract_strided_slice %215 {offsets = [0, 96], sizes = [8, 32], strides = [1, 1]} : vector<8x128xf32> to vector<8x32xf32>
    %221 = arith.mulf %218, %204 : vector<8x32xf32>
    %222 = arith.mulf %217, %219 : vector<8x32xf32>
    %223 = arith.addf %221, %222 : vector<8x32xf32>
    %224 = math.tanh %223 : vector<8x32xf32>
    %225 = arith.mulf %220, %224 : vector<8x32xf32>
    %c16_55 = arith.constant 16 : index
    %c0_56 = arith.constant 0 : index
    %226 = vector.load %arg11[%c16_55, %c0_56] : memref<64x32xf32, #tpu.memory_space<vmem>>, vector<8x32xf32>
    tpu.vector_store %arg11[%c16_55, %c0_56], %225 {strides = array<i32>} : memref<64x32xf32, #tpu.memory_space<vmem>>, vector<8x32xf32>,
    %227 = vector.extract_strided_slice %167 {offsets = [24, 0], sizes = [8, 128], strides = [1, 1]} : vector<64x128xf32> to vector<8x128xf32>
    %cst_57 = arith.constant dense<0.000000e+00> : vector<8x128xf32>
    %228 = tpu.matmul %225, %163, %cst_57 {dimension_numbers = #tpu.dot_dimension_numbers<[1], [0], [0], [1], [0, 0, 1, 1], [], []>} : vector<8x32xf32>, vector<32x128xf32>, vector<8x128xf32> -> vector<8x128xf32>
    %229 = arith.addf %227, %228 : vector<8x128xf32>
    %230 = arith.negf %229 : vector<8x128xf32>
    %231 = math.exp %230 : vector<8x128xf32>
    %cst_58 = arith.constant 1.000000e+00 : f32
    %232 = vector.broadcast %cst_58 : f32 to vector<8x128xf32>
    %233 = arith.addf %232, %231 : vector<8x128xf32>
    %234 = arith.divf %232, %233 : vector<8x128xf32>
    %235 = math.tanh %229 : vector<8x128xf32>
    %236 = vector.extract_strided_slice %234 {offsets = [0, 0], sizes = [8, 32], strides = [1, 1]} : vector<8x128xf32> to vector<8x32xf32>
    %237 = vector.extract_strided_slice %234 {offsets = [0, 32], sizes = [8, 32], strides = [1, 1]} : vector<8x128xf32> to vector<8x32xf32>
    %238 = vector.extract_strided_slice %235 {offsets = [0, 64], sizes = [8, 32], strides = [1, 1]} : vector<8x128xf32> to vector<8x32xf32>
    %239 = vector.extract_strided_slice %234 {offsets = [0, 96], sizes = [8, 32], strides = [1, 1]} : vector<8x128xf32> to vector<8x32xf32>
    %240 = arith.mulf %237, %223 : vector<8x32xf32>
    %241 = arith.mulf %236, %238 : vector<8x32xf32>
    %242 = arith.addf %240, %241 : vector<8x32xf32>
    %243 = math.tanh %242 : vector<8x32xf32>
    %244 = arith.mulf %239, %243 : vector<8x32xf32>
    %c24_59 = arith.constant 24 : index
    %c0_60 = arith.constant 0 : index
    %245 = vector.load %arg11[%c24_59, %c0_60] : memref<64x32xf32, #tpu.memory_space<vmem>>, vector<8x32xf32>
    tpu.vector_store %arg11[%c24_59, %c0_60], %244 {strides = array<i32>} : memref<64x32xf32, #tpu.memory_space<vmem>>, vector<8x32xf32>,
    %246 = vector.extract_strided_slice %167 {offsets = [32, 0], sizes = [8, 128], strides = [1, 1]} : vector<64x128xf32> to vector<8x128xf32>
    %cst_61 = arith.constant dense<0.000000e+00> : vector<8x128xf32>
    %247 = tpu.matmul %244, %163, %cst_61 {dimension_numbers = #tpu.dot_dimension_numbers<[1], [0], [0], [1], [0, 0, 1, 1], [], []>} : vector<8x32xf32>, vector<32x128xf32>, vector<8x128xf32> -> vector<8x128xf32>
    %248 = arith.addf %246, %247 : vector<8x128xf32>
    %249 = arith.negf %248 : vector<8x128xf32>
    %250 = math.exp %249 : vector<8x128xf32>
    %cst_62 = arith.constant 1.000000e+00 : f32
    %251 = vector.broadcast %cst_62 : f32 to vector<8x128xf32>
    %252 = arith.addf %251, %250 : vector<8x128xf32>
    %253 = arith.divf %251, %252 : vector<8x128xf32>
    %254 = math.tanh %248 : vector<8x128xf32>
    %255 = vector.extract_strided_slice %253 {offsets = [0, 0], sizes = [8, 32], strides = [1, 1]} : vector<8x128xf32> to vector<8x32xf32>
    %256 = vector.extract_strided_slice %253 {offsets = [0, 32], sizes = [8, 32], strides = [1, 1]} : vector<8x128xf32> to vector<8x32xf32>
    %257 = vector.extract_strided_slice %254 {offsets = [0, 64], sizes = [8, 32], strides = [1, 1]} : vector<8x128xf32> to vector<8x32xf32>
    %258 = vector.extract_strided_slice %253 {offsets = [0, 96], sizes = [8, 32], strides = [1, 1]} : vector<8x128xf32> to vector<8x32xf32>
    %259 = arith.mulf %256, %242 : vector<8x32xf32>
    %260 = arith.mulf %255, %257 : vector<8x32xf32>
    %261 = arith.addf %259, %260 : vector<8x32xf32>
    %262 = math.tanh %261 : vector<8x32xf32>
    %263 = arith.mulf %258, %262 : vector<8x32xf32>
    %c32_63 = arith.constant 32 : index
    %c0_64 = arith.constant 0 : index
    %264 = vector.load %arg11[%c32_63, %c0_64] : memref<64x32xf32, #tpu.memory_space<vmem>>, vector<8x32xf32>
    tpu.vector_store %arg11[%c32_63, %c0_64], %263 {strides = array<i32>} : memref<64x32xf32, #tpu.memory_space<vmem>>, vector<8x32xf32>,
    %265 = vector.extract_strided_slice %167 {offsets = [40, 0], sizes = [8, 128], strides = [1, 1]} : vector<64x128xf32> to vector<8x128xf32>
    %cst_65 = arith.constant dense<0.000000e+00> : vector<8x128xf32>
    %266 = tpu.matmul %263, %163, %cst_65 {dimension_numbers = #tpu.dot_dimension_numbers<[1], [0], [0], [1], [0, 0, 1, 1], [], []>} : vector<8x32xf32>, vector<32x128xf32>, vector<8x128xf32> -> vector<8x128xf32>
    %267 = arith.addf %265, %266 : vector<8x128xf32>
    %268 = arith.negf %267 : vector<8x128xf32>
    %269 = math.exp %268 : vector<8x128xf32>
    %cst_66 = arith.constant 1.000000e+00 : f32
    %270 = vector.broadcast %cst_66 : f32 to vector<8x128xf32>
    %271 = arith.addf %270, %269 : vector<8x128xf32>
    %272 = arith.divf %270, %271 : vector<8x128xf32>
    %273 = math.tanh %267 : vector<8x128xf32>
    %274 = vector.extract_strided_slice %272 {offsets = [0, 0], sizes = [8, 32], strides = [1, 1]} : vector<8x128xf32> to vector<8x32xf32>
    %275 = vector.extract_strided_slice %272 {offsets = [0, 32], sizes = [8, 32], strides = [1, 1]} : vector<8x128xf32> to vector<8x32xf32>
    %276 = vector.extract_strided_slice %273 {offsets = [0, 64], sizes = [8, 32], strides = [1, 1]} : vector<8x128xf32> to vector<8x32xf32>
    %277 = vector.extract_strided_slice %272 {offsets = [0, 96], sizes = [8, 32], strides = [1, 1]} : vector<8x128xf32> to vector<8x32xf32>
    %278 = arith.mulf %275, %261 : vector<8x32xf32>
    %279 = arith.mulf %274, %276 : vector<8x32xf32>
    %280 = arith.addf %278, %279 : vector<8x32xf32>
    %281 = math.tanh %280 : vector<8x32xf32>
    %282 = arith.mulf %277, %281 : vector<8x32xf32>
    %c40_67 = arith.constant 40 : index
    %c0_68 = arith.constant 0 : index
    %283 = vector.load %arg11[%c40_67, %c0_68] : memref<64x32xf32, #tpu.memory_space<vmem>>, vector<8x32xf32>
    tpu.vector_store %arg11[%c40_67, %c0_68], %282 {strides = array<i32>} : memref<64x32xf32, #tpu.memory_space<vmem>>, vector<8x32xf32>,
    %284 = vector.extract_strided_slice %167 {offsets = [48, 0], sizes = [8, 128], strides = [1, 1]} : vector<64x128xf32> to vector<8x128xf32>
    %cst_69 = arith.constant dense<0.000000e+00> : vector<8x128xf32>
    %285 = tpu.matmul %282, %163, %cst_69 {dimension_numbers = #tpu.dot_dimension_numbers<[1], [0], [0], [1], [0, 0, 1, 1], [], []>} : vector<8x32xf32>, vector<32x128xf32>, vector<8x128xf32> -> vector<8x128xf32>
    %286 = arith.addf %284, %285 : vector<8x128xf32>
    %287 = arith.negf %286 : vector<8x128xf32>
    %288 = math.exp %287 : vector<8x128xf32>
    %cst_70 = arith.constant 1.000000e+00 : f32
    %289 = vector.broadcast %cst_70 : f32 to vector<8x128xf32>
    %290 = arith.addf %289, %288 : vector<8x128xf32>
    %291 = arith.divf %289, %290 : vector<8x128xf32>
    %292 = math.tanh %286 : vector<8x128xf32>
    %293 = vector.extract_strided_slice %291 {offsets = [0, 0], sizes = [8, 32], strides = [1, 1]} : vector<8x128xf32> to vector<8x32xf32>
    %294 = vector.extract_strided_slice %291 {offsets = [0, 32], sizes = [8, 32], strides = [1, 1]} : vector<8x128xf32> to vector<8x32xf32>
    %295 = vector.extract_strided_slice %292 {offsets = [0, 64], sizes = [8, 32], strides = [1, 1]} : vector<8x128xf32> to vector<8x32xf32>
    %296 = vector.extract_strided_slice %291 {offsets = [0, 96], sizes = [8, 32], strides = [1, 1]} : vector<8x128xf32> to vector<8x32xf32>
    %297 = arith.mulf %294, %280 : vector<8x32xf32>
    %298 = arith.mulf %293, %295 : vector<8x32xf32>
    %299 = arith.addf %297, %298 : vector<8x32xf32>
    %300 = math.tanh %299 : vector<8x32xf32>
    %301 = arith.mulf %296, %300 : vector<8x32xf32>
    %c48_71 = arith.constant 48 : index
    %c0_72 = arith.constant 0 : index
    %302 = vector.load %arg11[%c48_71, %c0_72] : memref<64x32xf32, #tpu.memory_space<vmem>>, vector<8x32xf32>
    tpu.vector_store %arg11[%c48_71, %c0_72], %301 {strides = array<i32>} : memref<64x32xf32, #tpu.memory_space<vmem>>, vector<8x32xf32>,
    %303 = vector.extract_strided_slice %167 {offsets = [56, 0], sizes = [8, 128], strides = [1, 1]} : vector<64x128xf32> to vector<8x128xf32>
    %cst_73 = arith.constant dense<0.000000e+00> : vector<8x128xf32>
    %304 = tpu.matmul %301, %163, %cst_73 {dimension_numbers = #tpu.dot_dimension_numbers<[1], [0], [0], [1], [0, 0, 1, 1], [], []>} : vector<8x32xf32>, vector<32x128xf32>, vector<8x128xf32> -> vector<8x128xf32>
    %305 = arith.addf %303, %304 : vector<8x128xf32>
    %306 = arith.negf %305 : vector<8x128xf32>
    %307 = math.exp %306 : vector<8x128xf32>
    %cst_74 = arith.constant 1.000000e+00 : f32
    %308 = vector.broadcast %cst_74 : f32 to vector<8x128xf32>
    %309 = arith.addf %308, %307 : vector<8x128xf32>
    %310 = arith.divf %308, %309 : vector<8x128xf32>
    %311 = math.tanh %305 : vector<8x128xf32>
    %312 = vector.extract_strided_slice %310 {offsets = [0, 0], sizes = [8, 32], strides = [1, 1]} : vector<8x128xf32> to vector<8x32xf32>
    %313 = vector.extract_strided_slice %310 {offsets = [0, 32], sizes = [8, 32], strides = [1, 1]} : vector<8x128xf32> to vector<8x32xf32>
    %314 = vector.extract_strided_slice %311 {offsets = [0, 64], sizes = [8, 32], strides = [1, 1]} : vector<8x128xf32> to vector<8x32xf32>
    %315 = vector.extract_strided_slice %310 {offsets = [0, 96], sizes = [8, 32], strides = [1, 1]} : vector<8x128xf32> to vector<8x32xf32>
    %316 = arith.mulf %313, %299 : vector<8x32xf32>
    %317 = arith.mulf %312, %314 : vector<8x32xf32>
    %318 = arith.addf %316, %317 : vector<8x32xf32>
    %319 = math.tanh %318 : vector<8x32xf32>
    %320 = arith.mulf %315, %319 : vector<8x32xf32>
    %c56_75 = arith.constant 56 : index
    %c0_76 = arith.constant 0 : index
    %321 = vector.load %arg11[%c56_75, %c0_76] : memref<64x32xf32, #tpu.memory_space<vmem>>, vector<8x32xf32>
    tpu.vector_store %arg11[%c56_75, %c0_76], %320 {strides = array<i32>} : memref<64x32xf32, #tpu.memory_space<vmem>>, vector<8x32xf32>,
    %c0_77 = arith.constant 0 : index
    %c0_78 = arith.constant 0 : index
    %322 = vector.load %arg11[%c0_77, %c0_78] : memref<64x32xf32, #tpu.memory_space<vmem>>, vector<64x32xf32>
    %c0_79 = arith.constant 0 : index
    %c0_80 = arith.constant 0 : index
    %323 = vector.load %arg7[%c0_79, %c0_80] : memref<32x8xf32, #tpu.memory_space<vmem>>, vector<32x8xf32>
    %cst_81 = arith.constant dense<0.000000e+00> : vector<64x8xf32>
    %324 = tpu.matmul %322, %323, %cst_81 {dimension_numbers = #tpu.dot_dimension_numbers<[1], [0], [0], [1], [0, 0, 1, 1], [], []>} : vector<64x32xf32>, vector<32x8xf32>, vector<64x8xf32> -> vector<64x8xf32>
    %c0_82 = arith.constant 0 : index
    %c0_83 = arith.constant 0 : index
    %325 = vector.load %arg8[%c0_82, %c0_83] : memref<1x8xf32, #tpu.memory_space<vmem>>, vector<1x8xf32>
    %326 = vector.broadcast %325 : vector<1x8xf32> to vector<64x8xf32>
    %327 = arith.addf %324, %326 : vector<64x8xf32>
    %c0_84 = arith.constant 0 : index
    %c0_85 = arith.constant 0 : index
    %328 = vector.load %arg9[%c0_84, %c0_85] : memref<64x8xf32, #tpu.memory_space<vmem>>, vector<64x8xf32>
    tpu.vector_store %arg9[%c0_84, %c0_85], %327 {strides = array<i32>} : memref<64x8xf32, #tpu.memory_space<vmem>>, vector<64x8xf32>,
    return
  }
}

</mosaic_0001>

<bundles_post_ra>
// kernel: lstm_network_forward.1
= control target key start
LH: loop header
LB: loop body
LE: loop exit
PB: predicated region body
PF: predicated region fallthrough
CT: control target
= control target key end

     0   :  { %vm50_vm0 = vcmask 130048   ;;  %v1531_v7 = vmov 0.0   ;;  %s1532_s23 = smov 64   ;;  %vm116_vm5 = vcmask 261120   ;;  %s1973_s2 = inlined_call_operand.vmem [shape: f32[32,128], index: 2, kind: input, shape index: {}]   ;;  %s1974_s1 = inlined_call_operand.vmem [shape: f32[16,128], index: 1, kind: input, shape index: {}]   ;;  %s1975_s0 = inlined_call_operand.vmem [shape: f32[64,16], index: 0, kind: input, shape index: {}]   ;;  %s1976_s3 = inlined_call_operand.vmem [shape: f32[1,128], index: 3, kind: input, shape index: {}]   ;;  %s1977_s4 = inlined_call_operand.vmem [shape: f32[32,128], index: 4, kind: input, shape index: {}]   ;;  %s1978_s6 = inlined_call_operand.vmem [shape: f32[1,128], index: 6, kind: input, shape index: {}]   ;;  %s1979_s5 = inlined_call_operand.vmem [shape: f32[32,128], index: 5, kind: input, shape index: {}]   ;;  %s1980_s7 = inlined_call_operand.vmem [shape: f32[32,8], index: 7, kind: input, shape index: {}]   ;;  %s1981_s8 = inlined_call_operand.vmem [shape: f32[1,8], index: 8, kind: input, shape index: {}]   ;;  %s1982_s9 = inlined_call_operand.vmem [shape: f32[64,8], index: 9, kind: output, shape index: {}]  }
   0x1   :  { %v1587_v0 = vld [vmem:[%s1973_s2 + $0x18] sm:$0xff]  ;;  %v41_v1 = vld [vmem:[%s1974_s1 + $0x8] sm:$0xff]  ;;  %v1595_v2 = vld [vmem:[%s1973_s2 + $0x10] sm:$0xff] }
   0x2   :  { %132 = vmatpush.msra.mxu1 %v1587_v0  ;;  %89 = vmatpush.msra.mxu0 %v41_v1  ;;  %v40_v3 = vld [vmem:[%s1974_s1] sm:$0xff]  ;;  %v1607_v5 = vld [vmem:[%s1973_s2 + $0x8] sm:$0xff]  ;;  %v34_v63 = vld [vmem:[%s1975_s0 + $0x10] sm:$0xff] }
   0x3   :  { %v32_v4 = vld [vmem:[%s1975_s0] sm:$0xff]  ;;  %197 = vmatpush.msra.mxu2 %v1587_v0  ;;  %262 = vmatpush.msra.mxu3 %v1587_v0  ;;  %v33_v35 = vld [vmem:[%s1975_s0 + $0x8] sm:$0xff] }
   0x4   :  { %133 = vmatpush.msra.mxu1 %v1595_v2  ;;  %90 = vmatpush.msra.mxu0 %v40_v3  ;;  %v1616_v6 = vld [vmem:[%s1973_s2] sm:$0xff] }
   0x5   :  { %1335 = vmatmul.msk.f32.vlgmr.msra.gmra.mxu0 %vm50_vm0, %v32_v4  ;;  %198 = vmatpush.msra.mxu2 %v1595_v2  ;;  %v1646_v8 = vld [vmem:[%s1976_s3] ss:$0 sm:$0xff]  ;;  %s1533_s3 = smov 32  }
   0x6   :  { %134 = vmatpush.msra.mxu1 %v1607_v5  ;;  %263 = vmatpush.msra.mxu3 %v1595_v2 }
   0x7   :  { %199 = vmatpush.msra.mxu2 %v1607_v5 }
   0x8   :  { %135 = vmatpush.msra.mxu1 %v1616_v6  ;;  %264 = vmatpush.msra.mxu3 %v1607_v5 }
   0x9   :  { %136 = vmatmul.f32.vlgmr.msra.gmra.mxu1 %v1531_v7  ;;  %200 = vmatpush.msra.mxu2 %v1616_v6 }
   0xa   :  { %265 = vmatpush.msra.mxu3 %v1616_v6  ;;  %327 = vmatpush.msrb.mxu1 %v1587_v0 }
   0xb   :  { %392 = vmatpush.msrb.mxu2 %v1587_v0 }
   0xc   :  { %457 = vmatpush.msrb.mxu3 %v1587_v0  ;;  %328 = vmatpush.msrb.mxu1 %v1595_v2 }
   0xd   :  { %393 = vmatpush.msrb.mxu2 %v1595_v2  ;;  %1336 = vmatmul.msk.f32.gmra.mxu0 %vm50_vm0, %v33_v35 }
   0xe   :  { %458 = vmatpush.msrb.mxu3 %v1595_v2  ;;  %329 = vmatpush.msrb.mxu1 %v1607_v5 }
   0xf   :  { %394 = vmatpush.msrb.mxu2 %v1607_v5 }
  0x10   :  { %459 = vmatpush.msrb.mxu3 %v1607_v5  ;;  %330 = vmatpush.msrb.mxu1 %v1616_v6 }
  0x11   :  { %395 = vmatpush.msrb.mxu2 %v1616_v6 }
  0x12   :  { %460 = vmatpush.msrb.mxu3 %v1616_v6  ;;  %522 = vmatpush.msra.mxu1 %v1587_v0 }
  0x14   :  { %523 = vmatpush.msra.mxu1 %v1595_v2 }
  0x15   :  { %1337 = vmatmul.msk.f32.gmra.mxu0 %vm50_vm0, %v34_v63 }
  0x16   :  { %524 = vmatpush.msra.mxu1 %v1607_v5 }
  0x18   :  { %525 = vmatpush.msra.mxu1 %v1616_v6 }
  0x82   :  { %v92_v9 = vpop.f32.mrf.mxu0 }
  0x83   :  { %v93_v10 = vadd.f32 %v1646_v8, %v92_v9 }
  0x86   :  { %v137_v11 = vpop.f32.mrf.mxu1 }
  0x87   :  { %v140_v12 = vadd.f32 %v137_v11, %v93_v10 }
  0x89   :  { %1403 = vtanh.f32 %v140_v12  ;;  %v1343_v14 = vmul.f32 -1.442695, %v140_v12 }
  0x8a   :  { %v95_v37 = vpop.f32.mrf.mxu0 }
  0x8b   :  { %1405 = vpow2.f32 %v1343_v14  ;;  %v96_v38 = vadd.f32 %v1646_v8, %v95_v37 }
  0x8f   :  { %v1404_v13 = vpop.eup %1403 }
  0x90   :  { %163 = vrot.lane.b32.xlu0 %v1404_v13, %s1532_s23 }
  0x91   :  { %v1406_v15 = vpop.eup %1405 }
  0x92   :  { %v144_v16 = vadd.f32 1.0, %v1406_v15  ;;  %v98_v1 = vpop.f32.mrf.mxu0 }
  0x94   :  { %1407 = vrcp.f32 %v144_v16  ;;  %v156_v22 = vand.u32 2147483648, %v144_v16  ;;  %vm150_vm2 = vweird.f32 %v144_v16  ;;  %v154_v23 = vand.u32 2147483647, %v144_v16 }
  0x96   :  { %v157_v25 = vor.u32 1.1754944e-38, %v156_v22  ;;  %vm155_vm4 = vcmp.eq.f32.partialorder %v154_v23, 8.507059e+37 }
  0x9a   :  { %v1408_v17 = vpop.eup %1407 }
  0x9b   :  { %v146_v18 = vmul.f32 %v1408_v17, %v144_v16  ;;  %vm151_vm1 = vweird.f32 %v1408_v17 }
  0x9c   :  { %vm152_vm3 = vmor %vm150_vm2, %vm151_vm1 }
  0x9d   :  { %v147_v19 = vsub.f32 1.0, %v146_v18 }
  0x9f   :  { %v148_v20 = vmul.f32 %v1408_v17, %v147_v19 }
  0xa1   :  { %v149_v21 = vadd.f32 %v1408_v17, %v148_v20 }
  0xa3   :  { %v153_v24 = vsel %vm152_vm3, %v1408_v17, %v149_v21 }
  0xa4   :  { %v158_v27 = vsel %vm155_vm4, %v157_v25, %v153_v24 }
  0xa5   :  { %v161_v29 = vmul.f32 0.0, %v158_v27 }
 0x102   :  { %v164_v26 = vpop.permute.xlu0 %163 }
 0x103   :  { %v166_v28 = vmul.f32 %v164_v26, %v158_v27 }
 0x105   :  { %168 = vrot.lane.b32.xlu0 %v166_v28, %s1533_s3 }
 0x177   :  { %v169_v30 = vpop.permute.xlu0 %168 }
 0x178   :  { %v171_v31 = vadd.f32 %v169_v30, %v161_v29 }
 0x17a   :  { %1409 = vtanh.f32 %v171_v31 }
 0x180   :  { %v1410_v32 = vpop.eup %1409 }
 0x181   :  { %174 = vrot.lane.b32.xlu1 %v1410_v32, %s1532_s23 }
 0x1f3   :  { %v175_v33 = vpop.permute.xlu1 %174 }
 0x1f4   :  { %v177_v34 = vmul.f32 %v175_v33, %v158_v27  ;;  %v35_v27 = vld [vmem:[%s1975_s0 + $0x18] sm:$0xff] }
 0x1f5   :  { %1338 = vmatmul.msk.f32.gmra.mxu0 %vm50_vm0, %v35_v27  ;;  %v646_v27 = vld [vmem:[%s1977_s4] sm:$0xff] }
 0x1f6   :  { %179 = vrot.lane.b32.xlu1 %v177_v34, %s1533_s3 }
 0x268   :  { %v180_v36 = vpop.permute.xlu1 %179 }
 0x269   :  { %182 = vst.msk [vmem:[#allocation2] sm:$0xff] %vm116_vm5, %v180_v36  ;;  %1344 = vmatmul.msk.f32.vlgmr.msra.gmra.mxu2 %vm116_vm5, %v180_v36 }
 0x26a   :  { %587 = vmatpush.msra.mxu2 %v1587_v0 }
 0x26c   :  { %588 = vmatpush.msra.mxu2 %v1595_v2  ;;  %v99_v2 = vadd.f32 %v1646_v8, %v98_v1 }
 0x26e   :  { %589 = vmatpush.msra.mxu2 %v1607_v5 }
 0x270   :  { %590 = vmatpush.msra.mxu2 %v1616_v6 }
 0x2ec   :  { %v202_v39 = vpop.f32.mrf.mxu2 }
 0x2ed   :  { %v205_v40 = vadd.f32 %v202_v39, %v96_v38 }
 0x2ef   :  { %1411 = vtanh.f32 %v205_v40  ;;  %v1345_v42 = vmul.f32 -1.442695, %v205_v40 }
 0x2f1   :  { %1413 = vpow2.f32 %v1345_v42 }
 0x2f5   :  { %v1412_v41 = vpop.eup %1411 }
 0x2f6   :  { %228 = vrot.lane.b32.xlu2 %v1412_v41, %s1532_s23 }
 0x2f7   :  { %v1414_v43 = vpop.eup %1413 }
 0x2f8   :  { %v209_v44 = vadd.f32 1.0, %v1414_v43 }
 0x2fa   :  { %1415 = vrcp.f32 %v209_v44  ;;  %v221_v50 = vand.u32 2147483648, %v209_v44  ;;  %vm215_vm7 = vweird.f32 %v209_v44  ;;  %v219_v51 = vand.u32 2147483647, %v209_v44 }
 0x2fc   :  { %v222_v53 = vor.u32 1.1754944e-38, %v221_v50  ;;  %vm220_vm9 = vcmp.eq.f32.partialorder %v219_v51, 8.507059e+37 }
 0x300   :  { %v1416_v45 = vpop.eup %1415 }
 0x301   :  { %v211_v46 = vmul.f32 %v1416_v45, %v209_v44  ;;  %vm216_vm6 = vweird.f32 %v1416_v45 }
 0x302   :  { %vm217_vm8 = vmor %vm215_vm7, %vm216_vm6 }
 0x303   :  { %v212_v47 = vsub.f32 1.0, %v211_v46 }
 0x305   :  { %v213_v48 = vmul.f32 %v1416_v45, %v212_v47 }
 0x307   :  { %v214_v49 = vadd.f32 %v1416_v45, %v213_v48 }
 0x309   :  { %v218_v52 = vsel %vm217_vm8, %v1416_v45, %v214_v49 }
 0x30a   :  { %v223_v55 = vsel %vm220_vm9, %v222_v53, %v218_v52 }
 0x30b   :  { %v226_v57 = vmul.f32 %v223_v55, %v171_v31  ;;  %v101_v31 = vpop.f32.mrf.mxu0 }
 0x30c   :  { %v102_v32 = vadd.f32 %v1646_v8, %v101_v31 }
 0x350   :  { %v229_v54 = vpop.permute.xlu2 %228 }
 0x351   :  { %v231_v56 = vmul.f32 %v229_v54, %v223_v55 }
 0x353   :  { %233 = vrot.lane.b32.xlu2 %v231_v56, %s1533_s3 }
 0x3ad   :  { %v234_v58 = vpop.permute.xlu2 %233 }
 0x3ae   :  { %v236_v59 = vadd.f32 %v234_v58, %v226_v57  ;;  %v36_v57 = vld [vmem:[%s1975_s0 + $0x20] sm:$0xff] }
 0x3af   :  { %1339 = vmatmul.msk.f32.gmra.mxu0 %vm50_vm0, %v36_v57 }
 0x3b0   :  { %1417 = vtanh.f32 %v236_v59 }
 0x3b6   :  { %v1418_v60 = vpop.eup %1417 }
 0x3b7   :  { %239 = vrot.lane.b32.xlu0 %v1418_v60, %s1532_s23 }
 0x429   :  { %v240_v61 = vpop.permute.xlu0 %239 }
 0x42a   :  { %v242_v62 = vmul.f32 %v240_v61, %v223_v55 }
 0x42c   :  { %244 = vrot.lane.b32.xlu1 %v242_v62, %s1533_s3 }
 0x49e   :  { %v245_v0 = vpop.permute.xlu1 %244 }
 0x49f   :  { %247 = vst.msk [vmem:[#allocation2 + $0x8] sm:$0xff] %vm116_vm5, %v245_v0  ;;  %1346 = vmatmul.msk.f32.vlgmr.msra.gmra.mxu3 %vm116_vm5, %v245_v0 }
 0x522   :  { %v267_v3 = vpop.f32.mrf.mxu3 }
 0x523   :  { %v270_v4 = vadd.f32 %v267_v3, %v99_v2 }
 0x525   :  { %1419 = vtanh.f32 %v270_v4  ;;  %v1347_v6 = vmul.f32 -1.442695, %v270_v4 }
 0x527   :  { %1421 = vpow2.f32 %v1347_v6 }
 0x52b   :  { %v1420_v5 = vpop.eup %1419 }
 0x52c   :  { %293 = vrot.lane.b32.xlu2 %v1420_v5, %s1532_s23 }
 0x52d   :  { %v1422_v9 = vpop.eup %1421 }
 0x52e   :  { %v274_v10 = vadd.f32 1.0, %v1422_v9 }
 0x530   :  { %1423 = vrcp.f32 %v274_v10  ;;  %v286_v16 = vand.u32 2147483648, %v274_v10  ;;  %vm280_vm11 = vweird.f32 %v274_v10  ;;  %v284_v17 = vand.u32 2147483647, %v274_v10 }
 0x532   :  { %v287_v19 = vor.u32 1.1754944e-38, %v286_v16  ;;  %vm285_vm13 = vcmp.eq.f32.partialorder %v284_v17, 8.507059e+37 }
 0x536   :  { %v1424_v11 = vpop.eup %1423 }
 0x537   :  { %v276_v12 = vmul.f32 %v1424_v11, %v274_v10  ;;  %vm281_vm10 = vweird.f32 %v1424_v11 }
 0x538   :  { %vm282_vm12 = vmor %vm280_vm11, %vm281_vm10 }
 0x539   :  { %v277_v13 = vsub.f32 1.0, %v276_v12 }
 0x53b   :  { %v278_v14 = vmul.f32 %v1424_v11, %v277_v13 }
 0x53d   :  { %v279_v15 = vadd.f32 %v1424_v11, %v278_v14 }
 0x53f   :  { %v283_v18 = vsel %vm282_vm12, %v1424_v11, %v279_v15 }
 0x540   :  { %v288_v21 = vsel %vm285_vm13, %v287_v19, %v283_v18 }
 0x541   :  { %v291_v23 = vmul.f32 %v288_v21, %v236_v59  ;;  %v104_v59 = vpop.f32.mrf.mxu0 }
 0x542   :  { %v105_v60 = vadd.f32 %v1646_v8, %v104_v59 }
 0x586   :  { %v294_v20 = vpop.permute.xlu2 %293 }
 0x587   :  { %v296_v22 = vmul.f32 %v294_v20, %v288_v21 }
 0x589   :  { %298 = vrot.lane.b32.xlu0 %v296_v22, %s1533_s3 }
 0x5fb   :  { %v299_v24 = vpop.permute.xlu0 %298 }
 0x5fc   :  { %v301_v25 = vadd.f32 %v299_v24, %v291_v23  ;;  %v649_v23 = vld [vmem:[%s1977_s4 + $0x18] sm:$0xff]  ;;  %v648_v24 = vld [vmem:[%s1977_s4 + $0x10] sm:$0xff] }
 0x5fd   :  { %694 = vmatpush.msra.mxu3 %v649_v23 }
 0x5fe   :  { %1425 = vtanh.f32 %v301_v25 }
 0x5ff   :  { %695 = vmatpush.msra.mxu3 %v648_v24 }
 0x604   :  { %v1426_v26 = vpop.eup %1425 }
 0x605   :  { %304 = vrot.lane.b32.xlu1 %v1426_v26, %s1532_s23  ;;  %v647_v26 = vld [vmem:[%s1977_s4 + $0x8] sm:$0xff] }
 0x606   :  { %696 = vmatpush.msra.mxu3 %v647_v26 }
 0x608   :  { %697 = vmatpush.msra.mxu3 %v646_v27 }
 0x677   :  { %v305_v28 = vpop.permute.xlu1 %304 }
 0x678   :  { %v307_v29 = vmul.f32 %v305_v28, %v288_v21 }
 0x67a   :  { %309 = vrot.lane.b32.xlu2 %v307_v29, %s1533_s3  ;;  %v638_v29 = vld [vmem:[#allocation2] sm:$0xff] }
 0x6d4   :  { %v310_v30 = vpop.permute.xlu2 %309 }
 0x6d5   :  { %312 = vst.msk [vmem:[#allocation2 + $0x10] sm:$0xff] %vm116_vm5, %v310_v30  ;;  %1348 = vmatmul.msk.f32.vlgmr.msrb.gmra.mxu1 %vm116_vm5, %v310_v30  ;;  %v639_v30 = vld [vmem:[#allocation2 + $0x8] sm:$0xff] }
 0x6dc   :  { %v640_v31 = vld [vmem:[#allocation2 + $0x10] sm:$0xff] }
 0x752   :  { %v332_v33 = vpop.f32.mrf.mxu1 }
 0x753   :  { %v335_v34 = vadd.f32 %v332_v33, %v102_v32 }
 0x755   :  { %1427 = vtanh.f32 %v335_v34  ;;  %v1349_v36 = vmul.f32 -1.442695, %v335_v34 }
 0x757   :  { %1429 = vpow2.f32 %v1349_v36 }
 0x75b   :  { %v1428_v35 = vpop.eup %1427 }
 0x75c   :  { %358 = vrot.lane.b32.xlu0 %v1428_v35, %s1532_s23 }
 0x75d   :  { %v1430_v37 = vpop.eup %1429 }
 0x75e   :  { %v339_v38 = vadd.f32 1.0, %v1430_v37 }
 0x760   :  { %1431 = vrcp.f32 %v339_v38  ;;  %v351_v44 = vand.u32 2147483648, %v339_v38  ;;  %vm345_vm15 = vweird.f32 %v339_v38  ;;  %v349_v45 = vand.u32 2147483647, %v339_v38 }
 0x762   :  { %v352_v47 = vor.u32 1.1754944e-38, %v351_v44  ;;  %vm350_vm2 = vcmp.eq.f32.partialorder %v349_v45, 8.507059e+37 }
 0x766   :  { %v1432_v39 = vpop.eup %1431 }
 0x767   :  { %v341_v40 = vmul.f32 %v1432_v39, %v339_v38  ;;  %vm346_vm14 = vweird.f32 %v1432_v39 }
 0x768   :  { %vm347_vm1 = vmor %vm345_vm15, %vm346_vm14 }
 0x769   :  { %v342_v41 = vsub.f32 1.0, %v341_v40 }
 0x76b   :  { %v343_v42 = vmul.f32 %v1432_v39, %v342_v41 }
 0x76d   :  { %v344_v43 = vadd.f32 %v1432_v39, %v343_v42 }
 0x76f   :  { %v348_v46 = vsel %vm347_vm1, %v1432_v39, %v344_v43 }
 0x770   :  { %v353_v49 = vsel %vm350_vm2, %v352_v47, %v348_v46 }
 0x771   :  { %v356_v51 = vmul.f32 %v353_v49, %v301_v25  ;;  %v37_v25 = vld [vmem:[%s1975_s0 + $0x28] sm:$0xff] }
 0x772   :  { %1340 = vmatmul.msk.f32.gmra.mxu0 %vm50_vm0, %v37_v25 }
 0x7ce   :  { %v359_v48 = vpop.permute.xlu0 %358 }
 0x7cf   :  { %v361_v50 = vmul.f32 %v359_v48, %v353_v49 }
 0x7d1   :  { %363 = vrot.lane.b32.xlu1 %v361_v50, %s1533_s3 }
 0x7ef   :  { %v107_v34 = vpop.f32.mrf.mxu0 }
 0x7f0   :  { %v108_v35 = vadd.f32 %v1646_v8, %v107_v34 }
 0x843   :  { %v364_v52 = vpop.permute.xlu1 %363 }
 0x844   :  { %v366_v53 = vadd.f32 %v364_v52, %v356_v51 }
 0x846   :  { %1433 = vtanh.f32 %v366_v53 }
 0x84c   :  { %v1434_v54 = vpop.eup %1433 }
 0x84d   :  { %369 = vrot.lane.b32.xlu2 %v1434_v54, %s1532_s23 }
 0x8a7   :  { %v370_v55 = vpop.permute.xlu2 %369 }
 0x8a8   :  { %v372_v56 = vmul.f32 %v370_v55, %v353_v49 }
 0x8aa   :  { %374 = vrot.lane.b32.xlu0 %v372_v56, %s1533_s3 }
 0x91c   :  { %v375_v58 = vpop.permute.xlu0 %374 }
 0x91d   :  { %377 = vst.msk [vmem:[#allocation2 + $0x18] sm:$0xff] %vm116_vm5, %v375_v58  ;;  %1350 = vmatmul.msk.f32.vlgmr.msrb.gmra.mxu2 %vm116_vm5, %v375_v58  ;;  %v38_v58 = vld [vmem:[%s1975_s0 + $0x30] sm:$0xff] }
 0x91e   :  { %1341 = vmatmul.msk.f32.gmra.mxu0 %vm50_vm0, %v38_v58  ;;  %v1805_v58 = vld [vmem:[%s1980_s7 + $0x18] sm:$0xff] }
 0x91f   :  { %1293 = vmatpush.msrb.mxu0 %v1805_v58 }
 0x924   :  { %v641_v32 = vld [vmem:[#allocation2 + $0x18] sm:$0xff] }
 0x9a0   :  { %v397_v61 = vpop.f32.mrf.mxu2 }
 0x9a1   :  { %v400_v62 = vadd.f32 %v397_v61, %v105_v60  ;;  %v1739_v61 = vld [vmem:[%s1979_s5 + $0x18] sm:$0xff] }
 0x9a2   :  { %735 = vmatpush.msrb.mxu1 %v1739_v61  ;;  %800 = vmatpush.msrb.mxu2 %v1739_v61 }
 0x9a3   :  { %1435 = vtanh.f32 %v400_v62  ;;  %v1351_v0 = vmul.f32 -1.442695, %v400_v62  ;;  %v1744_v62 = vld [vmem:[%s1979_s5 + $0x10] sm:$0xff] }
 0x9a4   :  { %736 = vmatpush.msrb.mxu1 %v1744_v62  ;;  %801 = vmatpush.msrb.mxu2 %v1744_v62 }
 0x9a5   :  { %1437 = vpow2.f32 %v1351_v0  ;;  %v1758_v0 = vld [vmem:[%s1979_s5] sm:$0xff] }
 0x9a9   :  { %v1436_v63 = vpop.eup %1435 }
 0x9aa   :  { %423 = vrot.lane.b32.xlu1 %v1436_v63, %s1532_s23  ;;  %v1751_v63 = vld [vmem:[%s1979_s5 + $0x8] sm:$0xff] }
 0x9ab   :  { %v1438_v1 = vpop.eup %1437  ;;  %737 = vmatpush.msrb.mxu1 %v1751_v63  ;;  %802 = vmatpush.msrb.mxu2 %v1751_v63 }
 0x9ac   :  { %v404_v2 = vadd.f32 1.0, %v1438_v1 }
 0x9ad   :  { %738 = vmatpush.msrb.mxu1 %v1758_v0  ;;  %803 = vmatpush.msrb.mxu2 %v1758_v0 }
 0x9ae   :  { %1439 = vrcp.f32 %v404_v2  ;;  %v416_v10 = vand.u32 2147483648, %v404_v2  ;;  %vm410_vm4 = vweird.f32 %v404_v2  ;;  %v414_v11 = vand.u32 2147483647, %v404_v2 }
 0x9b0   :  { %v417_v13 = vor.u32 1.1754944e-38, %v416_v10  ;;  %vm415_vm7 = vcmp.eq.f32.partialorder %v414_v11, 8.507059e+37 }
 0x9b4   :  { %v1440_v3 = vpop.eup %1439 }
 0x9b5   :  { %v406_v4 = vmul.f32 %v1440_v3, %v404_v2  ;;  %vm411_vm3 = vweird.f32 %v1440_v3 }
 0x9b6   :  { %vm412_vm6 = vmor %vm410_vm4, %vm411_vm3 }
 0x9b7   :  { %v407_v5 = vsub.f32 1.0, %v406_v4 }
 0x9b9   :  { %v408_v6 = vmul.f32 %v1440_v3, %v407_v5 }
 0x9bb   :  { %v409_v9 = vadd.f32 %v1440_v3, %v408_v6 }
 0x9bd   :  { %v413_v12 = vsel %vm412_vm6, %v1440_v3, %v409_v9  ;;  %v110_v3 = vpop.f32.mrf.mxu0  ;;  %v1780_v9 = vld [vmem:[%s1978_s6] ss:$0 sm:$0xff] }
 0x9be   :  { %v418_v15 = vsel %vm415_vm7, %v417_v13, %v413_v12  ;;  %v111_v4 = vadd.f32 %v1646_v8, %v110_v3 }
 0x9bf   :  { %v421_v17 = vmul.f32 %v418_v15, %v366_v53 }
 0xa1c   :  { %v424_v14 = vpop.permute.xlu1 %423 }
 0xa1d   :  { %v426_v16 = vmul.f32 %v424_v14, %v418_v15 }
 0xa1f   :  { %428 = vrot.lane.b32.xlu2 %v426_v16, %s1533_s3 }
 0xa79   :  { %v429_v18 = vpop.permute.xlu2 %428 }
 0xa7a   :  { %v431_v19 = vadd.f32 %v429_v18, %v421_v17 }
 0xa7c   :  { %1441 = vtanh.f32 %v431_v19 }
 0xa82   :  { %v1442_v20 = vpop.eup %1441 }
 0xa83   :  { %434 = vrot.lane.b32.xlu0 %v1442_v20, %s1532_s23 }
 0xaf5   :  { %v435_v21 = vpop.permute.xlu0 %434 }
 0xaf6   :  { %v437_v22 = vmul.f32 %v435_v21, %v418_v15 }
 0xaf8   :  { %439 = vrot.lane.b32.xlu1 %v437_v22, %s1533_s3 }
 0xb6a   :  { %v440_v28 = vpop.permute.xlu1 %439 }
 0xb6b   :  { %442 = vst.msk [vmem:[#allocation2 + $0x20] sm:$0xff] %vm116_vm5, %v440_v28  ;;  %1352 = vmatmul.msk.f32.vlgmr.msrb.gmra.mxu3 %vm116_vm5, %v440_v28 }
 0xb72   :  { %v642_v33 = vld [vmem:[#allocation2 + $0x20] sm:$0xff] }
 0xb73   :  { %1358 = vmatmul.msk.f32.vlgmr.msra.gmra.mxu3 %vm116_vm5, %v638_v29 }
 0xb7b   :  { %1359 = vmatmul.msk.f32.gmra.mxu3 %vm116_vm5, %v639_v30 }
 0xb83   :  { %1360 = vmatmul.msk.f32.gmra.mxu3 %vm116_vm5, %v640_v31 }
 0xb8b   :  { %1361 = vmatmul.msk.f32.gmra.mxu3 %vm116_vm5, %v641_v32 }
 0xb93   :  { %1362 = vmatmul.msk.f32.gmra.mxu3 %vm116_vm5, %v642_v33 }
 0xbee   :  { %v462_v36 = vpop.f32.mrf.mxu3 }
 0xbef   :  { %v465_v37 = vadd.f32 %v462_v36, %v108_v35 }
 0xbf1   :  { %1443 = vtanh.f32 %v465_v37  ;;  %v1353_v39 = vmul.f32 -1.442695, %v465_v37 }
 0xbf3   :  { %1445 = vpow2.f32 %v1353_v39 }
 0xbf7   :  { %v1444_v38 = vpop.eup %1443 }
 0xbf8   :  { %488 = vrot.lane.b32.xlu2 %v1444_v38, %s1532_s23 }
 0xbf9   :  { %v1446_v40 = vpop.eup %1445 }
 0xbfa   :  { %v469_v41 = vadd.f32 1.0, %v1446_v40 }
 0xbfc   :  { %1447 = vrcp.f32 %v469_v41  ;;  %v481_v47 = vand.u32 2147483648, %v469_v41  ;;  %vm475_vm9 = vweird.f32 %v469_v41  ;;  %v479_v48 = vand.u32 2147483647, %v469_v41 }
 0xbfe   :  { %v482_v50 = vor.u32 1.1754944e-38, %v481_v47  ;;  %vm480_vm11 = vcmp.eq.f32.partialorder %v479_v48, 8.507059e+37 }
 0xc02   :  { %v1448_v42 = vpop.eup %1447 }
 0xc03   :  { %v471_v43 = vmul.f32 %v1448_v42, %v469_v41  ;;  %vm476_vm8 = vweird.f32 %v1448_v42 }
 0xc04   :  { %vm477_vm10 = vmor %vm475_vm9, %vm476_vm8 }
 0xc05   :  { %v472_v44 = vsub.f32 1.0, %v471_v43 }
 0xc07   :  { %v473_v45 = vmul.f32 %v1448_v42, %v472_v44 }
 0xc09   :  { %v474_v46 = vadd.f32 %v1448_v42, %v473_v45 }
 0xc0b   :  { %v478_v49 = vsel %vm477_vm10, %v1448_v42, %v474_v46 }
 0xc0c   :  { %v483_v52 = vsel %vm480_vm11, %v482_v50, %v478_v49 }
 0xc0d   :  { %v486_v54 = vmul.f32 %v483_v52, %v431_v19 }
 0xc52   :  { %v489_v51 = vpop.permute.xlu2 %488 }
 0xc53   :  { %v491_v53 = vmul.f32 %v489_v51, %v483_v52 }
 0xc55   :  { %493 = vrot.lane.b32.xlu0 %v491_v53, %s1533_s3 }
 0xcc7   :  { %v494_v55 = vpop.permute.xlu0 %493 }
 0xcc8   :  { %v1727_v56 = vadd.f32 %v494_v55, %v486_v54 }
 0xcca   :  { %1449 = vtanh.f32 %v1727_v56 }
 0xcd0   :  { %v1450_v57 = vpop.eup %1449 }
 0xcd1   :  { %499 = vrot.lane.b32.xlu1 %v1450_v57, %s1532_s23  ;;  %v39_v57 = vld [vmem:[%s1975_s0 + $0x38] sm:$0xff] }
 0xcd2   :  { %1342 = vmatmul.msk.f32.gmra.mxu0 %vm50_vm0, %v39_v57  ;;  %vm1322_vm0 = vcmask 64512  }
 0xd43   :  { %v500_v59 = vpop.permute.xlu1 %499 }
 0xd44   :  { %v502_v60 = vmul.f32 %v500_v59, %v483_v52  ;;  %v1810_v59 = vld [vmem:[%s1980_s7 + $0x10] sm:$0xff] }
 0xd45   :  { %1294 = vmatpush.msrb.mxu0 %v1810_v59 }
 0xd46   :  { %504 = vrot.lane.b32.xlu2 %v502_v60, %s1533_s3  ;;  %v1816_v60 = vld [vmem:[%s1980_s7 + $0x8] sm:$0xff] }
 0xd47   :  { %1295 = vmatpush.msrb.mxu0 %v1816_v60 }
 0xda0   :  { %v505_v1 = vpop.permute.xlu2 %504 }
 0xda1   :  { %507 = vst.msk [vmem:[#allocation2 + $0x28] sm:$0xff] %vm116_vm5, %v505_v1  ;;  %1354 = vmatmul.msk.f32.vlgmr.msra.gmra.mxu1 %vm116_vm5, %v505_v1  ;;  %v1822_v1 = vld [vmem:[%s1980_s7] sm:$0xff] }
 0xda2   :  { %865 = vmatpush.msra.mxu1 %v1739_v61  ;;  %1296 = vmatpush.msrb.mxu0 %v1822_v1 }
 0xda4   :  { %866 = vmatpush.msra.mxu1 %v1744_v62 }
 0xda6   :  { %867 = vmatpush.msra.mxu1 %v1751_v63 }
 0xda8   :  { %v643_v2 = vld [vmem:[#allocation2 + $0x28] sm:$0xff]  ;;  %868 = vmatpush.msra.mxu1 %v1758_v0 }
 0xda9   :  { %1363 = vmatmul.msk.f32.gmra.mxu3 %vm116_vm5, %v643_v2  ;;  %739 = vmatmul.f32.vlgmr.msrb.gmra.mxu1 %v1531_v7  ;;  %v699_v7 = vpop.f32.mrf.mxu3 }
 0xdaa   :  { %995 = vmatpush.msrb.mxu1 %v1739_v61  ;;  %v700_v10 = vadd.f32 %v1780_v9, %v699_v7 }
 0xdac   :  { %996 = vmatpush.msrb.mxu1 %v1744_v62 }
 0xdae   :  { %997 = vmatpush.msrb.mxu1 %v1751_v63 }
 0xdb0   :  { %998 = vmatpush.msrb.mxu1 %v1758_v0 }
 0xe1e   :  { %v527_v5 = vpop.f32.mrf.mxu1 }
 0xe1f   :  { %v530_v6 = vadd.f32 %v527_v5, %v111_v4 }
 0xe21   :  { %1451 = vtanh.f32 %v530_v6  ;;  %v1355_v15 = vmul.f32 -1.442695, %v530_v6  ;;  %v113_v6 = vpop.f32.mrf.mxu0 }
 0xe22   :  { %v114_v7 = vadd.f32 %v1646_v8, %v113_v6 }
 0xe26   :  { %v740_v11 = vpop.f32.mrf.mxu1 }
 0xe27   :  { %v1452_v12 = vpop.eup %1451  ;;  %v743_v13 = vadd.f32 %v740_v11, %v700_v10 }
 0xe28   :  { %553 = vrot.lane.b32.xlu0 %v1452_v12, %s1532_s23  ;;  %v702_v12 = vpop.f32.mrf.mxu3 }
 0xe29   :  { %1453 = vtanh.f32 %v743_v13  ;;  %v1366_v16 = vmul.f32 -1.442695, %v743_v13  ;;  %v703_v13 = vadd.f32 %v1780_v9, %v702_v12 }
 0xe2a   :  { %1455 = vpow2.f32 %v1355_v15 }
 0xe2b   :  { %1457 = vpow2.f32 %v1366_v16 }
 0xe2f   :  { %v1454_v14 = vpop.eup %1453 }
 0xe30   :  { %766 = vrot.lane.b32.xlu1 %v1454_v14, %s1532_s23  ;;  %v1456_v17 = vpop.eup %1455  ;;  %v1847_v14 = vld [vmem:[%s1981_s8] ss:$0 sm:$0xff] }
 0xe31   :  { %v534_v18 = vadd.f32 1.0, %v1456_v17  ;;  %v1458_v19 = vpop.eup %1457 }
 0xe32   :  { %v747_v20 = vadd.f32 1.0, %v1458_v19 }
 0xe33   :  { %1459 = vrcp.f32 %v534_v18  ;;  %v546_v29 = vand.u32 2147483648, %v534_v18  ;;  %vm540_vm13 = vweird.f32 %v534_v18  ;;  %v544_v30 = vand.u32 2147483647, %v534_v18 }
 0xe34   :  { %1461 = vrcp.f32 %v747_v20  ;;  %v759_v38 = vand.u32 2147483648, %v747_v20  ;;  %vm753_vm2 = vweird.f32 %v747_v20  ;;  %v757_v39 = vand.u32 2147483647, %v747_v20 }
 0xe35   :  { %v547_v33 = vor.u32 1.1754944e-38, %v546_v29  ;;  %vm545_vm15 = vcmp.eq.f32.partialorder %v544_v30, 8.507059e+37 }
 0xe36   :  { %v760_v41 = vor.u32 1.1754944e-38, %v759_v38  ;;  %vm758_vm4 = vcmp.eq.f32.partialorder %v757_v39, 8.507059e+37 }
 0xe39   :  { %v1460_v21 = vpop.eup %1459 }
 0xe3a   :  { %v536_v22 = vmul.f32 %v1460_v21, %v534_v18  ;;  %v1462_v24 = vpop.eup %1461  ;;  %vm541_vm12 = vweird.f32 %v1460_v21 }
 0xe3b   :  { %v749_v26 = vmul.f32 %v1462_v24, %v747_v20  ;;  %vm542_vm14 = vmor %vm540_vm13, %vm541_vm12  ;;  %vm754_vm1 = vweird.f32 %v1462_v24 }
 0xe3c   :  { %v537_v23 = vsub.f32 1.0, %v536_v22  ;;  %vm755_vm3 = vmor %vm753_vm2, %vm754_vm1 }
 0xe3d   :  { %v750_v28 = vsub.f32 1.0, %v749_v26 }
 0xe3e   :  { %v538_v25 = vmul.f32 %v1460_v21, %v537_v23 }
 0xe3f   :  { %v751_v32 = vmul.f32 %v1462_v24, %v750_v28 }
 0xe40   :  { %v539_v27 = vadd.f32 %v1460_v21, %v538_v25 }
 0xe41   :  { %v752_v37 = vadd.f32 %v1462_v24, %v751_v32 }
 0xe42   :  { %v543_v31 = vsel %vm542_vm14, %v1460_v21, %v539_v27 }
 0xe43   :  { %v548_v35 = vsel %vm545_vm15, %v547_v33, %v543_v31  ;;  %v756_v40 = vsel %vm755_vm3, %v1462_v24, %v752_v37 }
 0xe44   :  { %v761_v43 = vsel %vm758_vm4, %v760_v41, %v756_v40  ;;  %v551_v45 = vmul.f32 %v548_v35, %v1727_v56 }
 0xe45   :  { %v764_v49 = vmul.f32 0.0, %v761_v43 }
 0xe9a   :  { %v554_v34 = vpop.permute.xlu0 %553 }
 0xe9b   :  { %v556_v36 = vmul.f32 %v554_v34, %v548_v35 }
 0xe9d   :  { %558 = vrot.lane.b32.xlu2 %v556_v36, %s1533_s3 }
 0xea2   :  { %v767_v42 = vpop.permute.xlu1 %766 }
 0xea3   :  { %v769_v44 = vmul.f32 %v767_v42, %v761_v43  ;;  %v705_v42 = vpop.f32.mrf.mxu3 }
 0xea5   :  { %771 = vrot.lane.b32.xlu0 %v769_v44, %s1533_s3 }
 0xef7   :  { %v559_v46 = vpop.permute.xlu2 %558 }
 0xef8   :  { %v1788_v47 = vadd.f32 %v559_v46, %v551_v45 }
 0xefa   :  { %1463 = vtanh.f32 %v1788_v47 }
 0xf00   :  { %v1464_v48 = vpop.eup %1463 }
 0xf01   :  { %564 = vrot.lane.b32.xlu1 %v1464_v48, %s1532_s23 }
 0xf17   :  { %v772_v50 = vpop.permute.xlu0 %771 }
 0xf18   :  { %v1792_v51 = vadd.f32 %v772_v50, %v764_v49 }
 0xf1a   :  { %1465 = vtanh.f32 %v1792_v51 }
 0xf20   :  { %v1466_v52 = vpop.eup %1465 }
 0xf21   :  { %777 = vrot.lane.b32.xlu2 %v1466_v52, %s1532_s23 }
 0xf73   :  { %v565_v53 = vpop.permute.xlu1 %564 }
 0xf74   :  { %v567_v54 = vmul.f32 %v565_v53, %v548_v35 }
 0xf76   :  { %569 = vrot.lane.b32.xlu0 %v567_v54, %s1533_s3 }
 0xf7b   :  { %v778_v55 = vpop.permute.xlu2 %777 }
 0xf7c   :  { %v780_v56 = vmul.f32 %v778_v55, %v761_v43  ;;  %v706_v43 = vadd.f32 %v1780_v9, %v705_v42 }
 0xf7e   :  { %782 = vrot.lane.b32.xlu1 %v780_v56, %s1533_s3 }
 0xfe8   :  { %v570_v2 = vpop.permute.xlu0 %569 }
 0xfe9   :  { %572 = vst.msk [vmem:[#allocation2 + $0x30] sm:$0xff] %vm116_vm5, %v570_v2  ;;  %1356 = vmatmul.msk.f32.vlgmr.msra.gmra.mxu2 %vm116_vm5, %v570_v2 }
 0xfea   :  { %930 = vmatpush.msra.mxu2 %v1739_v61 }
 0xfec   :  { %931 = vmatpush.msra.mxu2 %v1744_v62 }
 0xfee   :  { %932 = vmatpush.msra.mxu2 %v1751_v63 }
 0xff0   :  { %v783_v3 = vpop.permute.xlu1 %782  ;;  %v644_v4 = vld [vmem:[#allocation2 + $0x30] sm:$0xff]  ;;  %933 = vmatpush.msra.mxu2 %v1758_v0 }
 0xff1   :  { %785 = vst.msk [vmem:[#allocation3] sm:$0xff] %vm116_vm5, %v783_v3  ;;  %1364 = vmatmul.msk.f32.gmra.mxu3 %vm116_vm5, %v644_v4  ;;  %1367 = vmatmul.msk.f32.vlgmr.msrb.gmra.mxu2 %vm116_vm5, %v783_v3 }
 0xff2   :  { %1060 = vmatpush.msrb.mxu2 %v1739_v61 }
 0xff4   :  { %1061 = vmatpush.msrb.mxu2 %v1744_v62 }
 0xff6   :  { %1062 = vmatpush.msrb.mxu2 %v1751_v63 }
 0xff8   :  { %v1241_v5 = vld [vmem:[#allocation3] sm:$0xff]  ;;  %1063 = vmatpush.msrb.mxu2 %v1758_v0 }
 0xff9   :  { %1381 = vmatmul.msk.f32.vlgmr.msrb.gmra.mxu0 %vm116_vm5, %v1241_v5 }
0x106c   :  { %v592_v10 = vpop.f32.mrf.mxu2 }
0x106d   :  { %v1841_v11 = vadd.f32 %v592_v10, %v114_v7 }
0x1074   :  { %v805_v15 = vpop.f32.mrf.mxu2 }
0x1075   :  { %v808_v16 = vadd.f32 %v805_v15, %v703_v13 }
0x1076   :  { %v1298_v17 = vpop.f32.mrf.mxu0 }
0x1077   :  { %1467 = vtanh.f32 %v808_v16  ;;  %v1299_v18 = vadd.f32 %v1847_v14, %v1298_v17  ;;  %v1368_v19 = vmul.f32 -1.442695, %v808_v16 }
0x1079   :  { %1323 = vst.msk [vmem:[%s1982_s9] sm:$0xff] %vm1322_vm0, %v1299_v18  ;;  %1469 = vpow2.f32 %v1368_v19  ;;  %v708_v19 = vpop.f32.mrf.mxu3 }
0x107d   :  { %v1468_v8 = vpop.eup %1467 }
0x107e   :  { %831 = vrot.lane.b32.xlu2 %v1468_v8, %s1532_s23 }
0x107f   :  { %v1470_v20 = vpop.eup %1469 }
0x1080   :  { %v812_v21 = vadd.f32 1.0, %v1470_v20  ;;  %v709_v20 = vadd.f32 %v1780_v9, %v708_v19 }
0x1081   :  { %v711_v42 = vpop.f32.mrf.mxu3 }
0x1082   :  { %1471 = vrcp.f32 %v812_v21  ;;  %v824_v27 = vand.u32 2147483648, %v812_v21  ;;  %vm818_vm7 = vweird.f32 %v812_v21  ;;  %v822_v28 = vand.u32 2147483647, %v812_v21 }
0x1084   :  { %v825_v30 = vor.u32 1.1754944e-38, %v824_v27  ;;  %vm823_vm9 = vcmp.eq.f32.partialorder %v822_v28, 8.507059e+37 }
0x1088   :  { %v1472_v22 = vpop.eup %1471 }
0x1089   :  { %v814_v23 = vmul.f32 %v1472_v22, %v812_v21  ;;  %vm819_vm6 = vweird.f32 %v1472_v22 }
0x108a   :  { %vm820_vm8 = vmor %vm818_vm7, %vm819_vm6 }
0x108b   :  { %v815_v24 = vsub.f32 1.0, %v814_v23 }
0x108d   :  { %v816_v25 = vmul.f32 %v1472_v22, %v815_v24 }
0x108f   :  { %v817_v26 = vadd.f32 %v1472_v22, %v816_v25 }
0x1091   :  { %v821_v29 = vsel %vm820_vm8, %v1472_v22, %v817_v26 }
0x1092   :  { %v826_v32 = vsel %vm823_vm9, %v825_v30, %v821_v29 }
0x1093   :  { %v829_v34 = vmul.f32 %v826_v32, %v1792_v51 }
0x10d8   :  { %v832_v31 = vpop.permute.xlu2 %831 }
0x10d9   :  { %v834_v33 = vmul.f32 %v832_v31, %v826_v32 }
0x10db   :  { %836 = vrot.lane.b32.xlu0 %v834_v33, %s1533_s3 }
0x114d   :  { %v837_v35 = vpop.permute.xlu0 %836 }
0x114e   :  { %v839_v36 = vadd.f32 %v837_v35, %v829_v34 }
0x1150   :  { %1473 = vtanh.f32 %v839_v36 }
0x1156   :  { %v1474_v37 = vpop.eup %1473 }
0x1157   :  { %842 = vrot.lane.b32.xlu1 %v1474_v37, %s1532_s23 }
0x11c9   :  { %v843_v38 = vpop.permute.xlu1 %842 }
0x11ca   :  { %v845_v39 = vmul.f32 %v843_v38, %v826_v32 }
0x11cc   :  { %847 = vrot.lane.b32.xlu2 %v845_v39, %s1533_s3 }
0x1226   :  { %v848_v40 = vpop.permute.xlu2 %847 }
0x1227   :  { %850 = vst.msk [vmem:[#allocation3 + $0x8] sm:$0xff] %vm116_vm5, %v848_v40  ;;  %1369 = vmatmul.msk.f32.vlgmr.msra.gmra.mxu1 %vm116_vm5, %v848_v40 }
0x1228   :  { %1125 = vmatpush.msra.mxu1 %v1739_v61 }
0x122a   :  { %1126 = vmatpush.msra.mxu1 %v1744_v62 }
0x122c   :  { %1127 = vmatpush.msra.mxu1 %v1751_v63 }
0x122e   :  { %v1242_v41 = vld [vmem:[#allocation3 + $0x8] sm:$0xff]  ;;  %1128 = vmatpush.msra.mxu1 %v1758_v0 }
0x122f   :  { %1382 = vmatmul.msk.f32.gmra.mxu0 %vm116_vm5, %v1242_v41 }
0x12a4   :  { %v870_v44 = vpop.f32.mrf.mxu1 }
0x12a5   :  { %v873_v45 = vadd.f32 %v870_v44, %v706_v43  ;;  %v712_v43 = vadd.f32 %v1780_v9, %v711_v42 }
0x12a7   :  { %1475 = vtanh.f32 %v873_v45  ;;  %v1370_v50 = vmul.f32 -1.442695, %v873_v45 }
0x12a9   :  { %1477 = vpow2.f32 %v1370_v50 }
0x12ac   :  { %v1301_v46 = vpop.f32.mrf.mxu0 }
0x12ad   :  { %v1476_v48 = vpop.eup %1475  ;;  %v1302_v49 = vadd.f32 %v1847_v14, %v1301_v46 }
0x12ae   :  { %896 = vrot.lane.b32.xlu0 %v1476_v48, %s1532_s23 }
0x12af   :  { %1324 = vst.msk [vmem:[%s1982_s9 + $0x8] sm:$0xff] %vm1322_vm0, %v1302_v49  ;;  %v1478_v51 = vpop.eup %1477 }
0x12b0   :  { %v877_v52 = vadd.f32 1.0, %v1478_v51 }
0x12b2   :  { %1479 = vrcp.f32 %v877_v52  ;;  %v889_v2 = vand.u32 2147483648, %v877_v52  ;;  %vm883_vm11 = vweird.f32 %v877_v52  ;;  %v887_v3 = vand.u32 2147483647, %v877_v52 }
0x12b4   :  { %v890_v5 = vor.u32 1.1754944e-38, %v889_v2  ;;  %vm888_vm13 = vcmp.eq.f32.partialorder %v887_v3, 8.507059e+37 }
0x12b8   :  { %v1480_v53 = vpop.eup %1479 }
0x12b9   :  { %v879_v54 = vmul.f32 %v1480_v53, %v877_v52  ;;  %vm884_vm10 = vweird.f32 %v1480_v53 }
0x12ba   :  { %vm885_vm12 = vmor %vm883_vm11, %vm884_vm10 }
0x12bb   :  { %v880_v55 = vsub.f32 1.0, %v879_v54 }
0x12bd   :  { %v881_v56 = vmul.f32 %v1480_v53, %v880_v55 }
0x12bf   :  { %v882_v57 = vadd.f32 %v1480_v53, %v881_v56 }
0x12c1   :  { %v886_v4 = vsel %vm885_vm12, %v1480_v53, %v882_v57 }
0x12c2   :  { %v891_v7 = vsel %vm888_vm13, %v890_v5, %v886_v4 }
0x12c3   :  { %v894_v12 = vmul.f32 %v891_v7, %v839_v36 }
0x1320   :  { %v897_v6 = vpop.permute.xlu0 %896 }
0x1321   :  { %v899_v10 = vmul.f32 %v897_v6, %v891_v7 }
0x1323   :  { %901 = vrot.lane.b32.xlu1 %v899_v10, %s1533_s3 }
0x1395   :  { %v902_v13 = vpop.permute.xlu1 %901 }
0x1396   :  { %v904_v15 = vadd.f32 %v902_v13, %v894_v12 }
0x1398   :  { %1481 = vtanh.f32 %v904_v15 }
0x139e   :  { %v1482_v16 = vpop.eup %1481 }
0x139f   :  { %907 = vrot.lane.b32.xlu2 %v1482_v16, %s1532_s23 }
0x13f9   :  { %v908_v17 = vpop.permute.xlu2 %907 }
0x13fa   :  { %v910_v18 = vmul.f32 %v908_v17, %v891_v7 }
0x13fc   :  { %912 = vrot.lane.b32.xlu0 %v910_v18, %s1533_s3  ;;  %v714_v18 = vpop.f32.mrf.mxu3 }
0x146e   :  { %v913_v8 = vpop.permute.xlu0 %912 }
0x146f   :  { %915 = vst.msk [vmem:[#allocation3 + $0x10] sm:$0xff] %vm116_vm5, %v913_v8  ;;  %1371 = vmatmul.msk.f32.vlgmr.msra.gmra.mxu2 %vm116_vm5, %v913_v8  ;;  %v715_v8 = vadd.f32 %v1780_v9, %v714_v18 }
0x1470   :  { %1190 = vmatpush.msra.mxu2 %v1739_v61 }
0x1472   :  { %1191 = vmatpush.msra.mxu2 %v1744_v62 }
0x1474   :  { %1192 = vmatpush.msra.mxu2 %v1751_v63 }
0x1476   :  { %1193 = vmatpush.msra.mxu2 %v1758_v0 }
0x14f2   :  { %v935_v21 = vpop.f32.mrf.mxu2 }
0x14f3   :  { %v938_v22 = vadd.f32 %v935_v21, %v709_v20 }
0x14f5   :  { %1483 = vtanh.f32 %v938_v22  ;;  %v1372_v24 = vmul.f32 -1.442695, %v938_v22 }
0x14f7   :  { %1485 = vpow2.f32 %v1372_v24 }
0x14fb   :  { %v1484_v23 = vpop.eup %1483 }
0x14fc   :  { %961 = vrot.lane.b32.xlu1 %v1484_v23, %s1532_s23 }
0x14fd   :  { %v1486_v25 = vpop.eup %1485 }
0x14fe   :  { %v942_v26 = vadd.f32 1.0, %v1486_v25 }
0x1500   :  { %1487 = vrcp.f32 %v942_v26  ;;  %v954_v0 = vand.u32 2147483648, %v942_v26  ;;  %vm948_vm15 = vweird.f32 %v942_v26  ;;  %v952_v29 = vand.u32 2147483647, %v942_v26 }
0x1502   :  { %v955_v31 = vor.u32 1.1754944e-38, %v954_v0  ;;  %vm953_vm2 = vcmp.eq.f32.partialorder %v952_v29, 8.507059e+37 }
0x1506   :  { %v1488_v61 = vpop.eup %1487 }
0x1507   :  { %v944_v62 = vmul.f32 %v1488_v61, %v942_v26  ;;  %vm949_vm14 = vweird.f32 %v1488_v61 }
0x1508   :  { %vm950_vm1 = vmor %vm948_vm15, %vm949_vm14 }
0x1509   :  { %v945_v27 = vsub.f32 1.0, %v944_v62 }
0x150b   :  { %v946_v63 = vmul.f32 %v1488_v61, %v945_v27 }
0x150d   :  { %v947_v28 = vadd.f32 %v1488_v61, %v946_v63 }
0x150f   :  { %v951_v30 = vsel %vm950_vm1, %v1488_v61, %v947_v28 }
0x1510   :  { %v956_v33 = vsel %vm953_vm2, %v955_v31, %v951_v30 }
0x1511   :  { %v959_v35 = vmul.f32 %v956_v33, %v904_v15 }
0x156e   :  { %v962_v32 = vpop.permute.xlu1 %961 }
0x156f   :  { %v964_v34 = vmul.f32 %v962_v32, %v956_v33 }
0x1571   :  { %966 = vrot.lane.b32.xlu2 %v964_v34, %s1533_s3  ;;  %v1357_v34 = vmul.f32 -1.442695, %v1841_v11 }
0x15cb   :  { %v967_v36 = vpop.permute.xlu2 %966 }
0x15cc   :  { %v969_v37 = vadd.f32 %v967_v36, %v959_v35 }
0x15ce   :  { %1489 = vtanh.f32 %v969_v37 }
0x15d4   :  { %v1490_v38 = vpop.eup %1489 }
0x15d5   :  { %972 = vrot.lane.b32.xlu0 %v1490_v38, %s1532_s23 }
0x1647   :  { %v973_v39 = vpop.permute.xlu0 %972 }
0x1648   :  { %v975_v40 = vmul.f32 %v973_v39, %v956_v33 }
0x164a   :  { %977 = vrot.lane.b32.xlu1 %v975_v40, %s1533_s3 }
0x16bc   :  { %v978_v41 = vpop.permute.xlu1 %977 }
0x16bd   :  { %980 = vst.msk [vmem:[#allocation3 + $0x18] sm:$0xff] %vm116_vm5, %v978_v41  ;;  %1373 = vmatmul.msk.f32.vlgmr.msrb.gmra.mxu1 %vm116_vm5, %v978_v41 }
0x16be   :  { %1389 = vmatpush.msrb.mxu1 %v1805_v58 }
0x16c0   :  { %1391 = vmatpush.msrb.mxu1 %v1810_v59 }
0x16c2   :  { %1393 = vmatpush.msrb.mxu1 %v1816_v60 }
0x16c4   :  { %1395 = vmatpush.msrb.mxu1 %v1822_v1 }
0x173a   :  { %v1000_v44 = vpop.f32.mrf.mxu1 }
0x173b   :  { %v1003_v45 = vadd.f32 %v1000_v44, %v712_v43 }
0x173d   :  { %1491 = vtanh.f32 %v1003_v45  ;;  %v1374_v48 = vmul.f32 -1.442695, %v1003_v45 }
0x173f   :  { %1493 = vpow2.f32 %v1374_v48 }
0x1743   :  { %v1492_v46 = vpop.eup %1491 }
0x1744   :  { %1026 = vrot.lane.b32.xlu2 %v1492_v46, %s1532_s23 }
0x1745   :  { %v1494_v49 = vpop.eup %1493 }
0x1746   :  { %v1007_v50 = vadd.f32 1.0, %v1494_v49 }
0x1748   :  { %1495 = vrcp.f32 %v1007_v50  ;;  %v1019_v56 = vand.u32 2147483648, %v1007_v50  ;;  %vm1013_vm4 = vweird.f32 %v1007_v50  ;;  %v1017_v57 = vand.u32 2147483647, %v1007_v50 }
0x174a   :  { %v1020_v3 = vor.u32 1.1754944e-38, %v1019_v56  ;;  %vm1018_vm7 = vcmp.eq.f32.partialorder %v1017_v57, 8.507059e+37 }
0x174e   :  { %v1496_v51 = vpop.eup %1495 }
0x174f   :  { %v1009_v52 = vmul.f32 %v1496_v51, %v1007_v50  ;;  %vm1014_vm3 = vweird.f32 %v1496_v51 }
0x1750   :  { %vm1015_vm6 = vmor %vm1013_vm4, %vm1014_vm3 }
0x1751   :  { %v1010_v53 = vsub.f32 1.0, %v1009_v52  ;;  %v1243_v52 = vld [vmem:[#allocation3 + $0x10] sm:$0xff] }
0x1753   :  { %v1011_v54 = vmul.f32 %v1496_v51, %v1010_v53  ;;  %v1244_v53 = vld [vmem:[#allocation3 + $0x18] sm:$0xff] }
0x1755   :  { %v1012_v55 = vadd.f32 %v1496_v51, %v1011_v54 }
0x1757   :  { %v1016_v2 = vsel %vm1015_vm6, %v1496_v51, %v1012_v55  ;;  %v717_v55 = vpop.f32.mrf.mxu3 }
0x1758   :  { %v1021_v5 = vsel %vm1018_vm7, %v1020_v3, %v1016_v2  ;;  %v718_v56 = vadd.f32 %v1780_v9, %v717_v55 }
0x1759   :  { %v1024_v7 = vmul.f32 %v1021_v5, %v969_v37 }
0x179e   :  { %v1027_v4 = vpop.permute.xlu2 %1026 }
0x179f   :  { %v1029_v6 = vmul.f32 %v1027_v4, %v1021_v5 }
0x17a1   :  { %1031 = vrot.lane.b32.xlu0 %v1029_v6, %s1533_s3 }
0x1813   :  { %v1032_v10 = vpop.permute.xlu0 %1031 }
0x1814   :  { %v1034_v12 = vadd.f32 %v1032_v10, %v1024_v7 }
0x1816   :  { %1497 = vtanh.f32 %v1034_v12 }
0x181c   :  { %v1498_v13 = vpop.eup %1497 }
0x181d   :  { %1037 = vrot.lane.b32.xlu1 %v1498_v13, %s1532_s23 }
0x188f   :  { %v1038_v15 = vpop.permute.xlu1 %1037 }
0x1890   :  { %v1040_v16 = vmul.f32 %v1038_v15, %v1021_v5 }
0x1892   :  { %1042 = vrot.lane.b32.xlu2 %v1040_v16, %s1533_s3 }
0x18ec   :  { %v1043_v17 = vpop.permute.xlu2 %1042 }
0x18ed   :  { %1045 = vst.msk [vmem:[#allocation3 + $0x20] sm:$0xff] %vm116_vm5, %v1043_v17  ;;  %1375 = vmatmul.msk.f32.vlgmr.msrb.gmra.mxu2 %vm116_vm5, %v1043_v17 }
0x18ee   :  { %1390 = vmatpush.msrb.mxu2 %v1805_v58 }
0x18f0   :  { %1392 = vmatpush.msrb.mxu2 %v1810_v59 }
0x18f2   :  { %1394 = vmatpush.msrb.mxu2 %v1816_v60 }
0x18f4   :  { %1396 = vmatpush.msrb.mxu2 %v1822_v1  ;;  %v1245_v54 = vld [vmem:[#allocation3 + $0x20] sm:$0xff] }
0x1970   :  { %v1065_v19 = vpop.f32.mrf.mxu2 }
0x1971   :  { %v1068_v20 = vadd.f32 %v1065_v19, %v715_v8 }
0x1973   :  { %1499 = vtanh.f32 %v1068_v20  ;;  %v1376_v22 = vmul.f32 -1.442695, %v1068_v20 }
0x1975   :  { %1501 = vpow2.f32 %v1376_v22 }
0x1979   :  { %v1500_v21 = vpop.eup %1499 }
0x197a   :  { %1091 = vrot.lane.b32.xlu0 %v1500_v21, %s1532_s23 }
0x197b   :  { %v1502_v23 = vpop.eup %1501 }
0x197c   :  { %v1072_v24 = vadd.f32 1.0, %v1502_v23 }
0x197e   :  { %1503 = vrcp.f32 %v1072_v24  ;;  %v1084_v1 = vand.u32 2147483648, %v1072_v24  ;;  %vm1078_vm9 = vweird.f32 %v1072_v24  ;;  %v1082_v61 = vand.u32 2147483647, %v1072_v24 }
0x197f   :  { %1505 = vtanh.f32 %v1841_v11 }
0x1980   :  { %v1085_v27 = vor.u32 1.1754944e-38, %v1084_v1  ;;  %vm1083_vm11 = vcmp.eq.f32.partialorder %v1082_v61, 8.507059e+37 }
0x1984   :  { %v1504_v58 = vpop.eup %1503 }
0x1985   :  { %v1074_v59 = vmul.f32 %v1504_v58, %v1072_v24  ;;  %vm1079_vm8 = vweird.f32 %v1504_v58  ;;  %v1506_v29 = vpop.eup %1505 }
0x1986   :  { %vm1080_vm10 = vmor %vm1078_vm9, %vm1079_vm8 }
0x1987   :  { %v1075_v25 = vsub.f32 1.0, %v1074_v59 }
0x1989   :  { %v1076_v60 = vmul.f32 %v1504_v58, %v1075_v25 }
0x198b   :  { %v1077_v26 = vadd.f32 %v1504_v58, %v1076_v60 }
0x198d   :  { %v1081_v62 = vsel %vm1080_vm10, %v1504_v58, %v1077_v26 }
0x198e   :  { %v1086_v28 = vsel %vm1083_vm11, %v1085_v27, %v1081_v62 }
0x198f   :  { %v1089_v30 = vmul.f32 %v1086_v28, %v1034_v12 }
0x19ec   :  { %v1092_v63 = vpop.permute.xlu0 %1091 }
0x19ed   :  { %v1094_v0 = vmul.f32 %v1092_v63, %v1086_v28 }
0x19ef   :  { %1096 = vrot.lane.b32.xlu1 %v1094_v0, %s1533_s3 }
0x19f7   :  { %618 = vrot.lane.b32.xlu1 %v1506_v29, %s1532_s23 }
0x1a61   :  { %v1097_v31 = vpop.permute.xlu1 %1096 }
0x1a62   :  { %v1909_v32 = vadd.f32 %v1097_v31, %v1089_v30 }
0x1a64   :  { %1507 = vtanh.f32 %v1909_v32 }
0x1a65   :  { %1509 = vpow2.f32 %v1357_v34 }
0x1a69   :  { %v619_v48 = vpop.permute.xlu1 %618 }
0x1a6a   :  { %v1508_v33 = vpop.eup %1507 }
0x1a6b   :  { %1102 = vrot.lane.b32.xlu2 %v1508_v33, %s1532_s23  ;;  %v1510_v35 = vpop.eup %1509 }
0x1a6c   :  { %v599_v36 = vadd.f32 1.0, %v1510_v35 }
0x1a6e   :  { %1511 = vrcp.f32 %v599_v36  ;;  %v611_v44 = vand.u32 2147483648, %v599_v36  ;;  %vm605_vm13 = vweird.f32 %v599_v36  ;;  %v609_v45 = vand.u32 2147483647, %v599_v36 }
0x1a70   :  { %v612_v11 = vor.u32 1.1754944e-38, %v611_v44  ;;  %vm610_vm15 = vcmp.eq.f32.partialorder %v609_v45, 8.507059e+37 }
0x1a74   :  { %v1512_v37 = vpop.eup %1511 }
0x1a75   :  { %v601_v38 = vmul.f32 %v1512_v37, %v599_v36  ;;  %vm606_vm12 = vweird.f32 %v1512_v37 }
0x1a76   :  { %vm607_vm14 = vmor %vm605_vm13, %vm606_vm12 }
0x1a77   :  { %v602_v39 = vsub.f32 1.0, %v601_v38 }
0x1a79   :  { %v603_v40 = vmul.f32 %v1512_v37, %v602_v39 }
0x1a7b   :  { %v604_v42 = vadd.f32 %v1512_v37, %v603_v40 }
0x1a7d   :  { %v608_v46 = vsel %vm607_vm14, %v1512_v37, %v604_v42 }
0x1a7e   :  { %v613_v49 = vsel %vm610_vm15, %v612_v11, %v608_v46 }
0x1a7f   :  { %v621_v50 = vmul.f32 %v619_v48, %v613_v49  ;;  %v616_v4 = vmul.f32 %v613_v49, %v1788_v47 }
0x1ac5   :  { %v1103_v41 = vpop.permute.xlu2 %1102 }
0x1ac6   :  { %v1105_v43 = vmul.f32 %v1103_v41, %v1086_v28 }
0x1ac8   :  { %1107 = vrot.lane.b32.xlu0 %v1105_v43, %s1533_s3 }
0x1ad0   :  { %623 = vrot.lane.b32.xlu0 %v621_v50, %s1533_s3 }
0x1b3a   :  { %v1108_v51 = vpop.permute.xlu0 %1107 }
0x1b3b   :  { %1110 = vst.msk [vmem:[#allocation3 + $0x28] sm:$0xff] %vm116_vm5, %v1108_v51  ;;  %1377 = vmatmul.msk.f32.vlgmr.msra.gmra.mxu1 %vm116_vm5, %v1108_v51 }
0x1b42   :  { %v624_v3 = vpop.permute.xlu0 %623 }
0x1b43   :  { %1383 = vmatmul.msk.f32.vlgmr.msrb.gmra.mxu1 %vm116_vm5, %v1243_v52  ;;  %v626_v5 = vadd.f32 %v624_v3, %v616_v4 }
0x1b4b   :  { %1384 = vmatmul.msk.f32.gmra.mxu1 %vm116_vm5, %v1244_v53 }
0x1b53   :  { %1385 = vmatmul.msk.f32.gmra.mxu1 %vm116_vm5, %v1245_v54 }
0x1bb8   :  { %v1130_v57 = vpop.f32.mrf.mxu1 }
0x1bb9   :  { %v1133_v2 = vadd.f32 %v1130_v57, %v718_v56 }
0x1bbb   :  { %1513 = vtanh.f32 %v1133_v2  ;;  %v1378_v17 = vmul.f32 -1.442695, %v1133_v2 }
0x1bbc   :  { %1515 = vtanh.f32 %v626_v5 }
0x1bbd   :  { %1517 = vpow2.f32 %v1378_v17 }
0x1bc0   :  { %v1304_v6 = vpop.f32.mrf.mxu1 }
0x1bc1   :  { %v1514_v7 = vpop.eup %1513  ;;  %v1305_v10 = vadd.f32 %v1847_v14, %v1304_v6 }
0x1bc2   :  { %1156 = vrot.lane.b32.xlu2 %v1514_v7, %s1532_s23  ;;  %v1516_v13 = vpop.eup %1515 }
0x1bc3   :  { %1325 = vst.msk [vmem:[%s1982_s9 + $0x10] sm:$0xff] %vm1322_vm0, %v1305_v10  ;;  %v1518_v18 = vpop.eup %1517 }
0x1bc4   :  { %v1137_v8 = vadd.f32 1.0, %v1518_v18 }
0x1bc6   :  { %1519 = vrcp.f32 %v1137_v8  ;;  %v1149_v24 = vand.u32 2147483648, %v1137_v8  ;;  %vm1143_vm2 = vweird.f32 %v1137_v8  ;;  %v1147_v58 = vand.u32 2147483647, %v1137_v8 }
0x1bc8   :  { %v1307_v12 = vpop.f32.mrf.mxu1  ;;  %v1150_v25 = vor.u32 1.1754944e-38, %v1149_v24  ;;  %vm1148_vm4 = vcmp.eq.f32.partialorder %v1147_v58, 8.507059e+37 }
0x1bc9   :  { %v1308_v15 = vadd.f32 %v1847_v14, %v1307_v12 }
0x1bca   :  { %629 = vrot.lane.b32.xlu2 %v1516_v13, %s1532_s23 }
0x1bcb   :  { %1326 = vst.msk [vmem:[%s1982_s9 + $0x18] sm:$0xff] %vm1322_vm0, %v1308_v15 }
0x1bcc   :  { %v1520_v19 = vpop.eup %1519 }
0x1bcd   :  { %v1139_v20 = vmul.f32 %v1520_v19, %v1137_v8  ;;  %vm1144_vm1 = vweird.f32 %v1520_v19 }
0x1bce   :  { %vm1145_vm3 = vmor %vm1143_vm2, %vm1144_vm1 }
0x1bcf   :  { %v1140_v21 = vsub.f32 1.0, %v1139_v20 }
0x1bd0   :  { %v1310_v47 = vpop.f32.mrf.mxu1 }
0x1bd1   :  { %v1311_v16 = vadd.f32 %v1847_v14, %v1310_v47  ;;  %v1141_v22 = vmul.f32 %v1520_v19, %v1140_v21 }
0x1bd3   :  { %1327 = vst.msk [vmem:[%s1982_s9 + $0x20] sm:$0xff] %vm1322_vm0, %v1311_v16  ;;  %v1142_v23 = vadd.f32 %v1520_v19, %v1141_v22 }
0x1bd5   :  { %v1146_v59 = vsel %vm1145_vm3, %v1520_v19, %v1142_v23 }
0x1bd6   :  { %v1151_v26 = vsel %vm1148_vm4, %v1150_v25, %v1146_v59 }
0x1bd7   :  { %v1154_v27 = vmul.f32 %v1151_v26, %v1909_v32  ;;  %v1246_v32 = vld [vmem:[#allocation3 + $0x28] sm:$0xff] }
0x1c1c   :  { %v1157_v60 = vpop.permute.xlu2 %1156 }
0x1c1d   :  { %v1159_v1 = vmul.f32 %v1157_v60, %v1151_v26 }
0x1c1f   :  { %1161 = vrot.lane.b32.xlu1 %v1159_v1, %s1533_s3 }
0x1c24   :  { %v630_v61 = vpop.permute.xlu2 %629 }
0x1c25   :  { %v632_v62 = vmul.f32 %v630_v61, %v613_v49 }
0x1c27   :  { %634 = vrot.lane.b32.xlu1 %v632_v62, %s1533_s3 }
0x1c91   :  { %v1162_v63 = vpop.permute.xlu1 %1161 }
0x1c92   :  { %v1164_v28 = vadd.f32 %v1162_v63, %v1154_v27 }
0x1c94   :  { %1521 = vtanh.f32 %v1164_v28 }
0x1c99   :  { %v635_v0 = vpop.permute.xlu1 %634 }
0x1c9a   :  { %v1522_v29 = vpop.eup %1521  ;;  %637 = vst.msk [vmem:[#allocation2 + $0x38] sm:$0xff] %vm116_vm5, %v635_v0 }
0x1c9b   :  { %1167 = vrot.lane.b32.xlu0 %v1522_v29, %s1532_s23 }
0x1ca1   :  { %v645_v30 = vld [vmem:[#allocation2 + $0x38] sm:$0xff] }
0x1ca2   :  { %1365 = vmatmul.msk.f32.gmra.mxu3 %vm116_vm5, %v645_v30 }
0x1d0d   :  { %v1168_v31 = vpop.permute.xlu0 %1167 }
0x1d0e   :  { %v1170_v33 = vmul.f32 %v1168_v31, %v1151_v26 }
0x1d10   :  { %1172 = vrot.lane.b32.xlu2 %v1170_v33, %s1533_s3 }
0x1d25   :  { %v720_v36 = vpop.f32.mrf.mxu3 }
0x1d26   :  { %v721_v37 = vadd.f32 %v1780_v9, %v720_v36 }
0x1d6a   :  { %v1173_v34 = vpop.permute.xlu2 %1172 }
0x1d6b   :  { %1175 = vst.msk [vmem:[#allocation3 + $0x30] sm:$0xff] %vm116_vm5, %v1173_v34  ;;  %1379 = vmatmul.msk.f32.vlgmr.msra.gmra.mxu2 %vm116_vm5, %v1173_v34 }
0x1d72   :  { %v1247_v35 = vld [vmem:[#allocation3 + $0x30] sm:$0xff] }
0x1d73   :  { %1386 = vmatmul.msk.f32.vlgmr.msrb.gmra.mxu2 %vm116_vm5, %v1246_v32 }
0x1d7b   :  { %1387 = vmatmul.msk.f32.gmra.mxu2 %vm116_vm5, %v1247_v35 }
0x1dee   :  { %v1195_v38 = vpop.f32.mrf.mxu2 }
0x1def   :  { %v1198_v39 = vadd.f32 %v1195_v38, %v721_v37 }
0x1df1   :  { %1523 = vtanh.f32 %v1198_v39  ;;  %v1380_v9 = vmul.f32 -1.442695, %v1198_v39 }
0x1df3   :  { %1525 = vpow2.f32 %v1380_v9 }
0x1df6   :  { %v1313_v40 = vpop.f32.mrf.mxu2 }
0x1df7   :  { %v1524_v41 = vpop.eup %1523  ;;  %v1314_v42 = vadd.f32 %v1847_v14, %v1313_v40 }
0x1df8   :  { %1221 = vrot.lane.b32.xlu0 %v1524_v41, %s1532_s23 }
0x1df9   :  { %1328 = vst.msk [vmem:[%s1982_s9 + $0x28] sm:$0xff] %vm1322_vm0, %v1314_v42  ;;  %v1526_v45 = vpop.eup %1525 }
0x1dfa   :  { %v1202_v46 = vadd.f32 1.0, %v1526_v45 }
0x1dfc   :  { %1527 = vrcp.f32 %v1202_v46  ;;  %v1214_v52 = vand.u32 2147483648, %v1202_v46  ;;  %vm1208_vm7 = vweird.f32 %v1202_v46  ;;  %v1212_v53 = vand.u32 2147483647, %v1202_v46 }
0x1dfe   :  { %v1316_v43 = vpop.f32.mrf.mxu2  ;;  %v1215_v55 = vor.u32 1.1754944e-38, %v1214_v52  ;;  %vm1213_vm9 = vcmp.eq.f32.partialorder %v1212_v53, 8.507059e+37 }
0x1dff   :  { %v1317_v44 = vadd.f32 %v1847_v14, %v1316_v43 }
0x1e01   :  { %1329 = vst.msk [vmem:[%s1982_s9 + $0x30] sm:$0xff] %vm1322_vm0, %v1317_v44 }
0x1e02   :  { %v1528_v11 = vpop.eup %1527 }
0x1e03   :  { %v1204_v48 = vmul.f32 %v1528_v11, %v1202_v46  ;;  %vm1209_vm6 = vweird.f32 %v1528_v11 }
0x1e04   :  { %vm1210_vm8 = vmor %vm1208_vm7, %vm1209_vm6 }
0x1e05   :  { %v1205_v49 = vsub.f32 1.0, %v1204_v48 }
0x1e07   :  { %v1206_v50 = vmul.f32 %v1528_v11, %v1205_v49 }
0x1e09   :  { %v1207_v51 = vadd.f32 %v1528_v11, %v1206_v50 }
0x1e0b   :  { %v1211_v54 = vsel %vm1210_vm8, %v1528_v11, %v1207_v51 }
0x1e0c   :  { %v1216_v57 = vsel %vm1213_vm9, %v1215_v55, %v1211_v54 }
0x1e0d   :  { %v1219_v3 = vmul.f32 %v1216_v57, %v1164_v28 }
0x1e6a   :  { %v1222_v56 = vpop.permute.xlu0 %1221 }
0x1e6b   :  { %v1224_v2 = vmul.f32 %v1222_v56, %v1216_v57 }
0x1e6d   :  { %1226 = vrot.lane.b32.xlu1 %v1224_v2, %s1533_s3 }
0x1edf   :  { %v1227_v4 = vpop.permute.xlu1 %1226 }
0x1ee0   :  { %v1229_v5 = vadd.f32 %v1227_v4, %v1219_v3 }
0x1ee2   :  { %1529 = vtanh.f32 %v1229_v5 }
0x1ee8   :  { %v1530_v6 = vpop.eup %1529 }
0x1ee9   :  { %1232 = vrot.lane.b32.xlu2 %v1530_v6, %s1532_s23 }
0x1f43   :  { %v1233_v7 = vpop.permute.xlu2 %1232 }
0x1f44   :  { %v1235_v10 = vmul.f32 %v1233_v7, %v1216_v57 }
0x1f46   :  { %1237 = vrot.lane.b32.xlu0 %v1235_v10, %s1533_s3 }
0x1fb8   :  { %v1238_v12 = vpop.permute.xlu0 %1237 }
0x1fb9   :  { %1240 = vst.msk [vmem:[#allocation3 + $0x38] sm:$0xff] %vm116_vm5, %v1238_v12 }
0x1fc0   :  { %v1248_v13 = vld [vmem:[#allocation3 + $0x38] sm:$0xff] }
0x1fc1   :  { %1388 = vmatmul.msk.f32.gmra.mxu2 %vm116_vm5, %v1248_v13 }
0x2044   :  { %v1319_v15 = vpop.f32.mrf.mxu2 }
0x2045   :  { %v1320_v47 = vadd.f32 %v1847_v14, %v1319_v15 }
0x2047   :  { %1330 = vst.msk [vmem:[%s1982_s9 + $0x38] sm:$0xff] %vm1322_vm0, %v1320_v47 }

</bundles_post_ra>
